<compile_context>
chip_gen: v7x
topology: tpu7x:2x2x1
jax: 0.10.0
libtpu: 0.0.40
codegen_flags: <defaults>
</compile_context>

<pallas_src>
import numpy as np
import jax
import jax.numpy as jnp
from jax.experimental import pallas as pl
from jax.experimental.pallas import tpu as pltpu


# ----------------------------------------------------------------------------
# Fused kernel: conv1 + ReLU + conv2 + ReLU + flatten(NCHW) + Linear
# ----------------------------------------------------------------------------
def cnn_fused_kernel(xpad_ref, t1_ref, b1_ref, t2_ref, b2_ref, wf_ref, bf_ref,
                     out_ref, h1pad_scr, h2_scr):
    """
    xpad_ref : (Bb, H+2, C0*W)   bf16  H-padded, lane-merged (c*W+w) input
    t1_ref   : (3, C0*W, C1*W)   bf16  per-dy row-Toeplitz conv1 weight
    b1_ref   : (1, C1*W)         f32   conv1 bias, repeated over W
    t2_ref   : (3, C1*W, C2*W)   bf16  per-dy row-Toeplitz conv2 weight
    b2_ref   : (1, C2*W)         f32   conv2 bias, repeated over W
    wf_ref   : (H*C2*W, O)       bf16  FC weight, NCHW flatten pre-folded
    bf_ref   : (1, O)            f32   FC bias
    out_ref  : (Bb, O)           f32
    h1pad_scr: (Bb, H+2, C1*W)   bf16  H-padded conv1 output
    h2_scr   : (Bb, H*C2*W)      bf16  FC input (lane offsets h*C2W, 128-aligned)
    """
    Bb, Hp, _ = xpad_ref.shape
    H = Hp - 2
    C1W = t1_ref.shape[-1]
    C2W = t2_ref.shape[-1]

    def conv_rows(pad_ref, t_ref, b_ref):
        # im2col as 3 accumulated per-dy matmuls: rows = (b, h), lanes = c*W+w.
        # bf16 LHS/RHS feed the MXU directly (f32 accumulation); the dx taps and
        # the W zero-padding are folded into the Toeplitz RHS.
        k = pad_ref.shape[-1]
        acc = None
        for dy in range(3):
            lhs = pad_ref[:, dy:dy + H, :].reshape(Bb * H, k)
            d = jnp.dot(lhs, t_ref[dy], preferred_element_type=jnp.float32)
            acc = d if acc is None else acc + d
        return jnp.maximum(acc + b_ref[...], 0.0)
    # TODO(synk): nn.Dropout is identity at inference; training-mode stochastic
    # masking (pltpu.prng_seed / prng_random_bits) is not implemented here.

    # --- conv1 + ReLU --------------------------------------------------------
    h1 = conv_rows(xpad_ref, t1_ref, b1_ref)                  # (Bb*H, C1W) f32

    # --- H-pad conv1 output: zero ONLY the two padding rows ------------------
    h1pad_scr[:, 0:1, :] = jnp.zeros((Bb, 1, C1W), h1pad_scr.dtype)
    h1pad_scr[:, H + 1:H + 2, :] = jnp.zeros((Bb, 1, C1W), h1pad_scr.dtype)
    h1pad_scr[:, 1:H + 1, :] = h1.reshape(Bb, H, C1W).astype(h1pad_scr.dtype)

    # --- conv2 + ReLU --------------------------------------------------------
    h2 = conv_rows(h1pad_scr, t2_ref, b2_ref)                 # (Bb*H, C2W) f32
    h2r = h2.reshape(Bb, H, C2W).astype(h2_scr.dtype)

    # --- FC: rows -> 128-aligned lane slabs, then ONE K=H*C2W matmul ---------
    for h in range(H):
        h2_scr[:, h * C2W:(h + 1) * C2W] = h2r[:, h, :]
    # NOTE: O=48 < 128 lanes -> masked final store; padding O costs more than
    # it saves at this size.
    out_ref[...] = (jnp.dot(h2_scr[...], wf_ref[...],
                            preferred_element_type=jnp.float32) + bf_ref[...])


# ----------------------------------------------------------------------------
# Wrapper
# ----------------------------------------------------------------------------
def cnn_forward(x, prepped, *, b_block=None):
    """x: (B, C0, H, W) NCHW f32; prepped: output of prepare_params()."""
    t1, b1l, t2, b2l, wf2d, bfl = prepped
    B, C0, H, W = x.shape
    C1W = t1.shape[-1]
    C2W = t2.shape[-1]
    O = wf2d.shape[-1]

    if b_block is None:
        # One step for small batches; 256-row chunks (multiple of 8) otherwise
        # so the M dimension fills the 256-wide MXU on v6e/v7x.
        b_block = B if B <= 256 else 256
    num_blocks = pl.cdiv(B, b_block)
    Bp = num_blocks * b_block

    # Free wrapper-side layout plumbing: NCHW -> (B, H, C0*W) lane-merged rows,
    # H zero-pad, batch pad to the block size, bf16 MXU input dtype.
    xr = jnp.transpose(x, (0, 2, 1, 3)).reshape(B, H, C0 * W)
    xpad = jnp.pad(xr, ((0, Bp - B), (1, 1), (0, 0))).astype(jnp.bfloat16)

    const3 = lambda i: (0, 0, 0)
    const2 = lambda i: (0, 0)
    out = pl.pallas_call(
        cnn_fused_kernel,
        out_shape=jax.ShapeDtypeStruct((Bp, O), jnp.float32),
        grid_spec=pltpu.PrefetchScalarGridSpec(
            num_scalar_prefetch=0,
            grid=(num_blocks,),
            in_specs=[
                pl.BlockSpec((b_block, H + 2, C0 * W), lambda i: (i, 0, 0)),
                # Weights/biases: constant index_maps -> DMA'd once, stay
                # VMEM-resident across grid steps.
                pl.BlockSpec(t1.shape, const3),
                pl.BlockSpec(b1l.shape, const2),
                pl.BlockSpec(t2.shape, const3),
                pl.BlockSpec(b2l.shape, const2),
                pl.BlockSpec(wf2d.shape, const2),
                pl.BlockSpec(bfl.shape, const2),
            ],
            out_specs=pl.BlockSpec((b_block, O), lambda i: (i, 0)),
            scratch_shapes=[
                pltpu.VMEM((b_block, H + 2, C1W), jnp.bfloat16),
                pltpu.VMEM((b_block, H * C2W), jnp.bfloat16),
            ]),
        compiler_params=pltpu.CompilerParams(
            dimension_semantics=("parallel",)),
    )(xpad, t1, b1l, t2, b2l, wf2d, bfl)
    return out[:B]


# ----------------------------------------------------------------------------
# One-time (outside jit) parameter preparation
# ----------------------------------------------------------------------------
def build_conv_toeplitz(w_oihw, W):
    """(Cout, Cin, 3, 3) PyTorch conv weight -> (3, Cin*W, Cout*W) slabs.

    t[dy, ci*W + wi, co*W + wo] = w[co, ci, dy, wi - wo + 1] when |wi - wo| <= 1,
    else 0 -- the dx taps and the padding=1 boundary along W are baked in."""
    w = np.asarray(w_oihw, np.float32)
    Cout, Cin, KH, KW = w.shape
    T = np.zeros((KH, Cin, W, Cout, W), np.float32)
    for dy in range(KH):
        for dx in range(KW):
            for wo in range(W):
                wi = wo + dx - 1
                if 0 <= wi < W:
                    T[dy, :, wi, :, wo] = w[:, :, dy, dx].T
    return jnp.asarray(T.reshape(KH, Cin * W, Cout * W))


def build_fc_2d(wf, C2, H, W):
    """(O, C2*H*W) PyTorch FC weight -> (H*C2*W, O).

    wf2d[h*(C2*W) + c*W + w, o] = wf[o, c*H*W + h*W + w]: the NCHW flatten is
    folded in so the kernel's (b, h-major, c*W+w) FC input needs no relayout."""
    wf_np = np.asarray(wf, np.float32)
    O = wf_np.shape[0]
    wf4 = wf_np.reshape(O, C2, H, W)
    return jnp.asarray(np.transpose(wf4, (2, 1, 3, 0)).reshape(H * C2 * W, O))


def prepare_params(w1, b1, w2, b2, wf, bf, H, W, wdtype=jnp.bfloat16):
    """Done ONCE outside the jitted forward: Toeplitz expansion, flatten fold,
    bias lane-replication, bf16 weight storage (f32 accumulation in-kernel)."""
    C1 = w1.shape[0]
    C2 = w2.shape[0]
    O = wf.shape[0]
    t1 = build_conv_toeplitz(w1, W).astype(wdtype)
    t2 = build_conv_toeplitz(w2, W).astype(wdtype)
    wf2d = build_fc_2d(wf, C2, H, W).astype(wdtype)
    b1l = jnp.repeat(jnp.asarray(b1, jnp.float32), W).reshape(1, C1 * W)
    b2l = jnp.repeat(jnp.asarray(b2, jnp.float32), W).reshape(1, C2 * W)
    bfl = jnp.asarray(bf, jnp.float32).reshape(1, O)
    return (t1, b1l, t2, b2l, wf2d, bfl)


def quantize(w, dtype=jnp.bfloat16):
    """bf16 round-trip so kernel and reference use identical effective weights."""
    return w.astype(dtype).astype(jnp.float32)


# ----------------------------------------------------------------------------
# Pure-JAX reference matching PyTorch NCHW semantics (f32 activations)
# ----------------------------------------------------------------------------
def reference_forward(x, params):
    w1, b1, w2, b2, wf, bf = params
    dn = ("NCHW", "OIHW", "NCHW")
    h = jax.lax.conv_general_dilated(x, w1, (1, 1), ((1, 1), (1, 1)),
                                     dimension_numbers=dn)
    h = jnp.maximum(h + b1[None, :, None, None], 0.0)
    h = jax.lax.conv_general_dilated(h, w2, (1, 1), ((1, 1), (1, 1)),
                                     dimension_numbers=dn)
    h = jnp.maximum(h + b2[None, :, None, None], 0.0)
    flat = h.reshape(h.shape[0], -1)
    return flat @ wf.T + bf


if __name__ == "__main__":
    # Module hyperparameters (consistent with the PyTorch __init__):
    #   in_channels=2, extra_layers=[32], num_cameras=4, num_joints_2d=16,
    #   output_size=48, dropout=0.1 (identity at inference).
    B = 2
    C0, C1, C2 = 2, 16, 32
    num_cameras, num_joints_2d = 4, 16          # spatial H, W
    H, W = num_cameras, num_joints_2d
    output_size = 48
    flattened_size = C2 * num_cameras * num_joints_2d

    key = jax.random.PRNGKey(0)
    k_x, k_w1, k_b1, k_w2, k_b2, k_wf, k_bf = jax.random.split(key, 7)

    x = jax.random.normal(k_x, (B, C0, H, W), jnp.float32)
    w1 = 0.05 * jax.random.normal(k_w1, (C1, C0, 3, 3), jnp.float32)
    b1 = 0.01 * jax.random.normal(k_b1, (C1,), jnp.float32)
    w2 = 0.05 * jax.random.normal(k_w2, (C2, C1, 3, 3), jnp.float32)
    b2 = 0.01 * jax.random.normal(k_b2, (C2,), jnp.float32)
    wf = 0.02 * jax.random.normal(k_wf, (output_size, flattened_size), jnp.float32)
    bf = 0.01 * jax.random.normal(k_bf, (output_size,), jnp.float32)

    # bf16 weight storage: quantize once so kernel and reference see the same
    # effective weights.  The kernel additionally rounds activations to bf16 at
    # the MXU inputs (f32 accumulation), hence the slightly relaxed tolerance.
    w1q, w2q, wfq = quantize(w1), quantize(w2), quantize(wf)
    prepped = prepare_params(w1q, b1, w2q, b2, wfq, bf, H, W)

    out = jax.jit(cnn_forward)(x, prepped)
    out = jax.block_until_ready(out)

    ref = reference_forward(x, (w1q, b1, w2q, b2, wfq, bf))
    assert out.shape == (B, output_size), out.shape
    max_err = float(jnp.max(jnp.abs(out - ref)))
    assert jnp.allclose(out, ref, rtol=5e-3, atol=5e-3), max_err

    print("KERNEL_OK")
</pallas_src>

<mosaic_0001>
module attributes {stable_mosaic.version = 11 : i64} {
  func.func @cnn_fused_kernel(%arg0: i32, %arg1: memref<2x6x32xbf16, #tpu.memory_space<vmem>>, %arg2: memref<3x32x256xbf16, #tpu.memory_space<vmem>>, %arg3: memref<1x256xf32, #tpu.memory_space<vmem>>, %arg4: memref<3x256x512xbf16, #tpu.memory_space<vmem>>, %arg5: memref<1x512xf32, #tpu.memory_space<vmem>>, %arg6: memref<2048x48xbf16, #tpu.memory_space<vmem>>, %arg7: memref<1x48xf32, #tpu.memory_space<vmem>>, %arg8: memref<2x48xf32, #tpu.memory_space<vmem>>, %arg9: memref<2x6x256xbf16, #tpu.memory_space<vmem>>, %arg10: memref<2x2048xbf16, #tpu.memory_space<vmem>>) attributes {dimension_semantics = [#tpu.dimension_semantics<parallel>], iteration_bounds = array<i64: 1>, scalar_prefetch = 0 : i64, scratch_operands = 2 : i64, tpu.core_type = #tpu.core_type<tc>, window_params = [{transform_indices = @transform_0, window_bounds = array<i64: 2, 6, 32>}, {pipeline_mode = #tpu.pipeline_mode<synchronous>, transform_indices = @transform_1, window_bounds = array<i64: 3, 32, 256>}, {pipeline_mode = #tpu.pipeline_mode<synchronous>, transform_indices = @transform_2, window_bounds = array<i64: 1, 256>}, {pipeline_mode = #tpu.pipeline_mode<synchronous>, transform_indices = @transform_3, window_bounds = array<i64: 3, 256, 512>}, {pipeline_mode = #tpu.pipeline_mode<synchronous>, transform_indices = @transform_4, window_bounds = array<i64: 1, 512>}, {pipeline_mode = #tpu.pipeline_mode<synchronous>, transform_indices = @transform_5, window_bounds = array<i64: 2048, 48>}, {pipeline_mode = #tpu.pipeline_mode<synchronous>, transform_indices = @transform_6, window_bounds = array<i64: 1, 48>}, {transform_indices = @transform_7, window_bounds = array<i64: 2, 48>}]} {
    %c0 = arith.constant 0 : index
    %c0_0 = arith.constant 0 : index
    %c0_1 = arith.constant 0 : index
    %0 = vector.load %arg1[%c0, %c0_0, %c0_1] : memref<2x6x32xbf16, #tpu.memory_space<vmem>>, vector<2x4x32xbf16>
    %1 = vector.shape_cast %0 : vector<2x4x32xbf16> to vector<8x32xbf16>
    %c0_2 = arith.constant 0 : index
    %c0_3 = arith.constant 0 : index
    %c0_4 = arith.constant 0 : index
    %2 = vector.load %arg2[%c0_2, %c0_3, %c0_4] : memref<3x32x256xbf16, #tpu.memory_space<vmem>>, vector<1x32x256xbf16>
    %3 = vector.shape_cast %2 : vector<1x32x256xbf16> to vector<32x256xbf16>
    %cst = arith.constant dense<0.000000e+00> : vector<8x256xf32>
    %4 = tpu.matmul %1, %3, %cst {dimension_numbers = #tpu.dot_dimension_numbers<[1], [0], [0], [1], [0, 0, 1, 1], [], []>} : vector<8x32xbf16>, vector<32x256xbf16>, vector<8x256xf32> -> vector<8x256xf32>
    %c0_5 = arith.constant 0 : index
    %c1 = arith.constant 1 : index
    %c0_6 = arith.constant 0 : index
    %5 = vector.load %arg1[%c0_5, %c1, %c0_6] : memref<2x6x32xbf16, #tpu.memory_space<vmem>>, vector<2x4x32xbf16>
    %6 = vector.shape_cast %5 : vector<2x4x32xbf16> to vector<8x32xbf16>
    %c1_7 = arith.constant 1 : index
    %c0_8 = arith.constant 0 : index
    %c0_9 = arith.constant 0 : index
    %7 = vector.load %arg2[%c1_7, %c0_8, %c0_9] : memref<3x32x256xbf16, #tpu.memory_space<vmem>>, vector<1x32x256xbf16>
    %8 = vector.shape_cast %7 : vector<1x32x256xbf16> to vector<32x256xbf16>
    %cst_10 = arith.constant dense<0.000000e+00> : vector<8x256xf32>
    %9 = tpu.matmul %6, %8, %cst_10 {dimension_numbers = #tpu.dot_dimension_numbers<[1], [0], [0], [1], [0, 0, 1, 1], [], []>} : vector<8x32xbf16>, vector<32x256xbf16>, vector<8x256xf32> -> vector<8x256xf32>
    %10 = arith.addf %4, %9 : vector<8x256xf32>
    %c0_11 = arith.constant 0 : index
    %c2 = arith.constant 2 : index
    %c0_12 = arith.constant 0 : index
    %11 = vector.load %arg1[%c0_11, %c2, %c0_12] : memref<2x6x32xbf16, #tpu.memory_space<vmem>>, vector<2x4x32xbf16>
    %12 = vector.shape_cast %11 : vector<2x4x32xbf16> to vector<8x32xbf16>
    %c2_13 = arith.constant 2 : index
    %c0_14 = arith.constant 0 : index
    %c0_15 = arith.constant 0 : index
    %13 = vector.load %arg2[%c2_13, %c0_14, %c0_15] : memref<3x32x256xbf16, #tpu.memory_space<vmem>>, vector<1x32x256xbf16>
    %14 = vector.shape_cast %13 : vector<1x32x256xbf16> to vector<32x256xbf16>
    %cst_16 = arith.constant dense<0.000000e+00> : vector<8x256xf32>
    %15 = tpu.matmul %12, %14, %cst_16 {dimension_numbers = #tpu.dot_dimension_numbers<[1], [0], [0], [1], [0, 0, 1, 1], [], []>} : vector<8x32xbf16>, vector<32x256xbf16>, vector<8x256xf32> -> vector<8x256xf32>
    %16 = arith.addf %10, %15 : vector<8x256xf32>
    %c0_17 = arith.constant 0 : index
    %c0_18 = arith.constant 0 : index
    %17 = vector.load %arg3[%c0_17, %c0_18] : memref<1x256xf32, #tpu.memory_space<vmem>>, vector<1x256xf32>
    %18 = vector.broadcast %17 : vector<1x256xf32> to vector<8x256xf32>
    %19 = arith.addf %16, %18 : vector<8x256xf32>
    %cst_19 = arith.constant 0.000000e+00 : f32
    %20 = vector.broadcast %cst_19 : f32 to vector<8x256xf32>
    %21 = arith.maximumf %19, %20 : vector<8x256xf32>
    %cst_20 = arith.constant 0.000000e+00 : bf16
    %22 = vector.broadcast %cst_20 : bf16 to vector<2x1x256xbf16>
    %c0_21 = arith.constant 0 : index
    %c0_22 = arith.constant 0 : index
    %c0_23 = arith.constant 0 : index
    %23 = vector.load %arg9[%c0_21, %c0_22, %c0_23] : memref<2x6x256xbf16, #tpu.memory_space<vmem>>, vector<2x1x256xbf16>
    tpu.vector_store %arg9[%c0_21, %c0_22, %c0_23], %22 {strides = array<i32>} : memref<2x6x256xbf16, #tpu.memory_space<vmem>>, vector<2x1x256xbf16>,
    %cst_24 = arith.constant 0.000000e+00 : bf16
    %24 = vector.broadcast %cst_24 : bf16 to vector<2x1x256xbf16>
    %c0_25 = arith.constant 0 : index
    %c5 = arith.constant 5 : index
    %c0_26 = arith.constant 0 : index
    %25 = vector.load %arg9[%c0_25, %c5, %c0_26] : memref<2x6x256xbf16, #tpu.memory_space<vmem>>, vector<2x1x256xbf16>
    tpu.vector_store %arg9[%c0_25, %c5, %c0_26], %24 {strides = array<i32>} : memref<2x6x256xbf16, #tpu.memory_space<vmem>>, vector<2x1x256xbf16>,
    %26 = vector.shape_cast %21 : vector<8x256xf32> to vector<2x4x256xf32>
    %27 = arith.truncf %26 : vector<2x4x256xf32> to vector<2x4x256xbf16>
    %c0_27 = arith.constant 0 : index
    %c1_28 = arith.constant 1 : index
    %c0_29 = arith.constant 0 : index
    %28 = vector.load %arg9[%c0_27, %c1_28, %c0_29] : memref<2x6x256xbf16, #tpu.memory_space<vmem>>, vector<2x4x256xbf16>
    tpu.vector_store %arg9[%c0_27, %c1_28, %c0_29], %27 {strides = array<i32>} : memref<2x6x256xbf16, #tpu.memory_space<vmem>>, vector<2x4x256xbf16>,
    %c0_30 = arith.constant 0 : index
    %c0_31 = arith.constant 0 : index
    %c0_32 = arith.constant 0 : index
    %29 = vector.load %arg9[%c0_30, %c0_31, %c0_32] : memref<2x6x256xbf16, #tpu.memory_space<vmem>>, vector<2x4x256xbf16>
    %30 = vector.shape_cast %29 : vector<2x4x256xbf16> to vector<8x256xbf16>
    %c0_33 = arith.constant 0 : index
    %c0_34 = arith.constant 0 : index
    %c0_35 = arith.constant 0 : index
    %31 = vector.load %arg4[%c0_33, %c0_34, %c0_35] : memref<3x256x512xbf16, #tpu.memory_space<vmem>>, vector<1x256x512xbf16>
    %32 = vector.shape_cast %31 : vector<1x256x512xbf16> to vector<256x512xbf16>
    %cst_36 = arith.constant dense<0.000000e+00> : vector<8x512xf32>
    %33 = tpu.matmul %30, %32, %cst_36 {dimension_numbers = #tpu.dot_dimension_numbers<[1], [0], [0], [1], [0, 0, 1, 1], [], []>} : vector<8x256xbf16>, vector<256x512xbf16>, vector<8x512xf32> -> vector<8x512xf32>
    %c0_37 = arith.constant 0 : index
    %c1_38 = arith.constant 1 : index
    %c0_39 = arith.constant 0 : index
    %34 = vector.load %arg9[%c0_37, %c1_38, %c0_39] : memref<2x6x256xbf16, #tpu.memory_space<vmem>>, vector<2x4x256xbf16>
    %35 = vector.shape_cast %34 : vector<2x4x256xbf16> to vector<8x256xbf16>
    %c1_40 = arith.constant 1 : index
    %c0_41 = arith.constant 0 : index
    %c0_42 = arith.constant 0 : index
    %36 = vector.load %arg4[%c1_40, %c0_41, %c0_42] : memref<3x256x512xbf16, #tpu.memory_space<vmem>>, vector<1x256x512xbf16>
    %37 = vector.shape_cast %36 : vector<1x256x512xbf16> to vector<256x512xbf16>
    %cst_43 = arith.constant dense<0.000000e+00> : vector<8x512xf32>
    %38 = tpu.matmul %35, %37, %cst_43 {dimension_numbers = #tpu.dot_dimension_numbers<[1], [0], [0], [1], [0, 0, 1, 1], [], []>} : vector<8x256xbf16>, vector<256x512xbf16>, vector<8x512xf32> -> vector<8x512xf32>
    %39 = arith.addf %33, %38 : vector<8x512xf32>
    %c0_44 = arith.constant 0 : index
    %c2_45 = arith.constant 2 : index
    %c0_46 = arith.constant 0 : index
    %40 = vector.load %arg9[%c0_44, %c2_45, %c0_46] : memref<2x6x256xbf16, #tpu.memory_space<vmem>>, vector<2x4x256xbf16>
    %41 = vector.shape_cast %40 : vector<2x4x256xbf16> to vector<8x256xbf16>
    %c2_47 = arith.constant 2 : index
    %c0_48 = arith.constant 0 : index
    %c0_49 = arith.constant 0 : index
    %42 = vector.load %arg4[%c2_47, %c0_48, %c0_49] : memref<3x256x512xbf16, #tpu.memory_space<vmem>>, vector<1x256x512xbf16>
    %43 = vector.shape_cast %42 : vector<1x256x512xbf16> to vector<256x512xbf16>
    %cst_50 = arith.constant dense<0.000000e+00> : vector<8x512xf32>
    %44 = tpu.matmul %41, %43, %cst_50 {dimension_numbers = #tpu.dot_dimension_numbers<[1], [0], [0], [1], [0, 0, 1, 1], [], []>} : vector<8x256xbf16>, vector<256x512xbf16>, vector<8x512xf32> -> vector<8x512xf32>
    %45 = arith.addf %39, %44 : vector<8x512xf32>
    %c0_51 = arith.constant 0 : index
    %c0_52 = arith.constant 0 : index
    %46 = vector.load %arg5[%c0_51, %c0_52] : memref<1x512xf32, #tpu.memory_space<vmem>>, vector<1x512xf32>
    %47 = vector.broadcast %46 : vector<1x512xf32> to vector<8x512xf32>
    %48 = arith.addf %45, %47 : vector<8x512xf32>
    %cst_53 = arith.constant 0.000000e+00 : f32
    %49 = vector.broadcast %cst_53 : f32 to vector<8x512xf32>
    %50 = arith.maximumf %48, %49 : vector<8x512xf32>
    %51 = vector.shape_cast %50 : vector<8x512xf32> to vector<2x4x512xf32>
    %52 = arith.truncf %51 : vector<2x4x512xf32> to vector<2x4x512xbf16>
    %53 = vector.extract_strided_slice %52 {offsets = [0, 0, 0], sizes = [2, 1, 512], strides = [1, 1, 1]} : vector<2x4x512xbf16> to vector<2x1x512xbf16>
    %54 = vector.shape_cast %53 : vector<2x1x512xbf16> to vector<2x512xbf16>
    %c0_54 = arith.constant 0 : index
    %c0_55 = arith.constant 0 : index
    %55 = vector.load %arg10[%c0_54, %c0_55] : memref<2x2048xbf16, #tpu.memory_space<vmem>>, vector<2x512xbf16>
    tpu.vector_store %arg10[%c0_54, %c0_55], %54 {strides = array<i32>} : memref<2x2048xbf16, #tpu.memory_space<vmem>>, vector<2x512xbf16>,
    %56 = vector.extract_strided_slice %52 {offsets = [0, 1, 0], sizes = [2, 1, 512], strides = [1, 1, 1]} : vector<2x4x512xbf16> to vector<2x1x512xbf16>
    %57 = vector.shape_cast %56 : vector<2x1x512xbf16> to vector<2x512xbf16>
    %c0_56 = arith.constant 0 : index
    %c512 = arith.constant 512 : index
    %58 = vector.load %arg10[%c0_56, %c512] : memref<2x2048xbf16, #tpu.memory_space<vmem>>, vector<2x512xbf16>
    tpu.vector_store %arg10[%c0_56, %c512], %57 {strides = array<i32>} : memref<2x2048xbf16, #tpu.memory_space<vmem>>, vector<2x512xbf16>,
    %59 = vector.extract_strided_slice %52 {offsets = [0, 2, 0], sizes = [2, 1, 512], strides = [1, 1, 1]} : vector<2x4x512xbf16> to vector<2x1x512xbf16>
    %60 = vector.shape_cast %59 : vector<2x1x512xbf16> to vector<2x512xbf16>
    %c0_57 = arith.constant 0 : index
    %c1024 = arith.constant 1024 : index
    %61 = vector.load %arg10[%c0_57, %c1024] : memref<2x2048xbf16, #tpu.memory_space<vmem>>, vector<2x512xbf16>
    tpu.vector_store %arg10[%c0_57, %c1024], %60 {strides = array<i32>} : memref<2x2048xbf16, #tpu.memory_space<vmem>>, vector<2x512xbf16>,
    %62 = vector.extract_strided_slice %52 {offsets = [0, 3, 0], sizes = [2, 1, 512], strides = [1, 1, 1]} : vector<2x4x512xbf16> to vector<2x1x512xbf16>
    %63 = vector.shape_cast %62 : vector<2x1x512xbf16> to vector<2x512xbf16>
    %c0_58 = arith.constant 0 : index
    %c1536 = arith.constant 1536 : index
    %64 = vector.load %arg10[%c0_58, %c1536] : memref<2x2048xbf16, #tpu.memory_space<vmem>>, vector<2x512xbf16>
    tpu.vector_store %arg10[%c0_58, %c1536], %63 {strides = array<i32>} : memref<2x2048xbf16, #tpu.memory_space<vmem>>, vector<2x512xbf16>,
    %c0_59 = arith.constant 0 : index
    %c0_60 = arith.constant 0 : index
    %65 = vector.load %arg10[%c0_59, %c0_60] : memref<2x2048xbf16, #tpu.memory_space<vmem>>, vector<2x2048xbf16>
    %c0_61 = arith.constant 0 : index
    %c0_62 = arith.constant 0 : index
    %66 = vector.load %arg6[%c0_61, %c0_62] : memref<2048x48xbf16, #tpu.memory_space<vmem>>, vector<2048x48xbf16>
    %cst_63 = arith.constant dense<0.000000e+00> : vector<2x48xf32>
    %67 = tpu.matmul %65, %66, %cst_63 {dimension_numbers = #tpu.dot_dimension_numbers<[1], [0], [0], [1], [0, 0, 1, 1], [], []>} : vector<2x2048xbf16>, vector<2048x48xbf16>, vector<2x48xf32> -> vector<2x48xf32>
    %c0_64 = arith.constant 0 : index
    %c0_65 = arith.constant 0 : index
    %68 = vector.load %arg7[%c0_64, %c0_65] : memref<1x48xf32, #tpu.memory_space<vmem>>, vector<1x48xf32>
    %69 = vector.broadcast %68 : vector<1x48xf32> to vector<2x48xf32>
    %70 = arith.addf %67, %69 : vector<2x48xf32>
    %c0_66 = arith.constant 0 : index
    %c0_67 = arith.constant 0 : index
    %71 = vector.load %arg8[%c0_66, %c0_67] : memref<2x48xf32, #tpu.memory_space<vmem>>, vector<2x48xf32>
    tpu.vector_store %arg8[%c0_66, %c0_67], %70 {strides = array<i32>} : memref<2x48xf32, #tpu.memory_space<vmem>>, vector<2x48xf32>,
    return
  }
  func.func @transform_0(%arg0: i32) -> (i32, i32, i32) {
    %c0_i32 = arith.constant 0 : i32
    %c0_i32_0 = arith.constant 0 : i32
    %c0_i32_1 = arith.constant 0 : i32
    return %arg0, %c0_i32, %c0_i32_0 : i32, i32, i32
  }
  func.func @transform_1(%arg0: i32) -> (i32, i32, i32) {
    %c0_i32 = arith.constant 0 : i32
    %c0_i32_0 = arith.constant 0 : i32
    %c0_i32_1 = arith.constant 0 : i32
    %c0_i32_2 = arith.constant 0 : i32
    return %c0_i32, %c0_i32_0, %c0_i32_1 : i32, i32, i32
  }
  func.func @transform_2(%arg0: i32) -> (i32, i32) {
    %c0_i32 = arith.constant 0 : i32
    %c0_i32_0 = arith.constant 0 : i32
    %c0_i32_1 = arith.constant 0 : i32
    return %c0_i32, %c0_i32_0 : i32, i32
  }
  func.func @transform_3(%arg0: i32) -> (i32, i32, i32) {
    %c0_i32 = arith.constant 0 : i32
    %c0_i32_0 = arith.constant 0 : i32
    %c0_i32_1 = arith.constant 0 : i32
    %c0_i32_2 = arith.constant 0 : i32
    return %c0_i32, %c0_i32_0, %c0_i32_1 : i32, i32, i32
  }
  func.func @transform_4(%arg0: i32) -> (i32, i32) {
    %c0_i32 = arith.constant 0 : i32
    %c0_i32_0 = arith.constant 0 : i32
    %c0_i32_1 = arith.constant 0 : i32
    return %c0_i32, %c0_i32_0 : i32, i32
  }
  func.func @transform_5(%arg0: i32) -> (i32, i32) {
    %c0_i32 = arith.constant 0 : i32
    %c0_i32_0 = arith.constant 0 : i32
    %c0_i32_1 = arith.constant 0 : i32
    return %c0_i32, %c0_i32_0 : i32, i32
  }
  func.func @transform_6(%arg0: i32) -> (i32, i32) {
    %c0_i32 = arith.constant 0 : i32
    %c0_i32_0 = arith.constant 0 : i32
    %c0_i32_1 = arith.constant 0 : i32
    return %c0_i32, %c0_i32_0 : i32, i32
  }
  func.func @transform_7(%arg0: i32) -> (i32, i32) {
    %c0_i32 = arith.constant 0 : i32
    %c0_i32_0 = arith.constant 0 : i32
    return %arg0, %c0_i32 : i32, i32
  }
}

</mosaic_0001>

<bundles_post_ra>
// kernel: cnn_forward.1
= control target key start
LH: loop header
LB: loop body
LE: loop exit
PB: predicated region body
PF: predicated region fallthrough
CT: control target
= control target key end

     0   :  { %12 = vsyncpa [#allocation5], 0  ;;  %s5633_s0 = inlined_call_operand.vmem [shape: bf16[2,6,32], index: 0, kind: input, shape index: {}]   ;;  %s5634_s1 = inlined_call_operand.vmem [shape: bf16[3,32,256], index: 1, kind: input, shape index: {}]   ;;  %s5635_s2 = inlined_call_operand.vmem [shape: f32[1,256], index: 2, kind: input, shape index: {}]   ;;  %s5636_s3 = inlined_call_operand.hbm [shape: bf16[3,256,512], index: 3, kind: input, shape index: {}]   ;;  %s5637_s4 = inlined_call_operand.vmem [shape: f32[1,512], index: 4, kind: input, shape index: {}]   ;;  %s5638_s5 = inlined_call_operand.vmem [shape: bf16[2048,48], index: 5, kind: input, shape index: {}]   ;;  %s5639_s6 = inlined_call_operand.vmem [shape: f32[1,48], index: 6, kind: input, shape index: {}]   ;;  %s5640_s7 = inlined_call_operand.hbm [shape: f32[2,48], index: 7, kind: output, shape index: {}]  }
   0x1   :  { %13 = vsyncpa [#allocation6], 0  ;;  %s4894_s24 = smov [#allocation4]   ;;  %s4846_s28 = scalar_lea.hbm %s5636_s3, 24576 }
   0x2   :  { %s25_s25 = sshll.u32 %s4894_s24, 4  ;;  %p4847_p0 = scmp.ne.s32.totalorder %s5636_s3, %s4846_s28  ;;  %s26_s25 = int_to_ptr.vmem [resolvable:$true] %s25_s25 }
   0x3   :  { %p4850_p1 = scmp.lt.u32.totalorder %s4846_s28, %s5636_s3 }
   0x5   :  { %p4852_p2 = pnand %p4850_p1, %p4847_p0 }
   0x7   :  { %4855 = shalt.err (!%p4852_p2)
}
   0x8   :  { %s4856_s10 = scalar_lea.vmem %s26_s25, 24576  ;;  %p4861_p4 = scmp.lt.s32.totalorder %s26_s25, %s26_s25 }
   0x9   :  { %p4857_p3 = scmp.ne.s32.totalorder %s26_s25, %s4856_s10  ;;  %p4862_p5 = scmp.lt.s32.totalorder %s4856_s10, %s4856_s10 }
   0xb   :  { %p4863_p6 = por %p4862_p5, %p4861_p4 }
   0xd   :  { %p4864_p7 = pnand %p4863_p6, %p4857_p3 }
   0xf   :  { %4867 = shalt.err (!%p4864_p7)
}
  0x10   :  { %s4895_s11 = smov 256   ;;  %s4896_s12 = smov 16  }
  0x11   :  { %31 = dma.hbm_to_vmem [thread:$0]  %s5636_s3, 24576, %s26_s25, [#allocation5], %s4895_s11, %s4895_s11, %s4896_s12  }
  0x12   :  { %4890 = dma.done.wait [#allocation5], 24576  }
  0x13   :  { %4891 = vsyncadd [#allocation5], 4294942720  ;;  %vm68_vm0 = vsmask.f32 1280  ;;  %v4897_v0 = vmov 0   ;;  %vm275_vm4 = vcmask 1040384   ;;  %v112_v2 = vlaneseq }
  0x14   :  { %172 = vmatprep.mubr.bf16.mxu0 %v4897_v0  ;;  %246 = vmatprep.mubr.bf16.mxu1 %v4897_v0  ;;  %vm69_vm1 = vsmask.f32 3336  ;;  %vm71_vm3 = vsmask.f32 5392  ;;  %vm276_vm5 = vcmask 1042434   ;;  %vm136_vm9 = vcmask 261120  }
  0x15   :  { %vm70_vm2 = vmor %vm68_vm0, %vm69_vm1  ;;  %v4898_v3 = vmov 1983009808   ;;  %v4408_v6 = vld [vmem:[%s5634_s1 + $0x24] ss:$8 sps:$4 sm:$0xff]   ;;  %v4410_v7 = vld [vmem:[%s5634_s1 + $0x20] ss:$8 sps:$4 sm:$0xff]  }
  0x16   :  { %vm4956_vm6 = vmor %vm70_vm2, %vm71_vm3  ;;  %v110_v4 = vunpack.c.l.s4 %v4898_v3  ;;  %vm73_vm8 = vsmask.f32 7448  ;;  %140 = vmatprep.subr.bf16.mxu0 %v4408_v6  ;;  %v4411_v8 = vld [vmem:[%s5634_s1 + $0x4] ss:$8 sps:$4 sm:$0xff]   ;;  %v4413_v9 = vld [vmem:[%s5634_s1] ss:$8 sps:$4 sm:$0xff]  }
  0x17   :  { %vm4962_vm7 = vmor %vm275_vm4, %vm276_vm5  ;;  %v4978_v10 = vshrl.u32 %v112_v2, 7  ;;  %141 = vmatpush1.bf16.msra.mxu0 %v4410_v7  ;;  %v4414_v11 = vld [vmem:[%s5634_s1 + $0x34] ss:$8 sps:$4 sm:$0xff]   ;;  %v4416_v12 = vld [vmem:[%s5634_s1 + $0x30] ss:$8 sps:$4 sm:$0xff]   ;;  %vm278_vm10 = vcmask 1044484   ;;  %214 = vmatprep.subr.bf16.mxu1 %v4411_v8 }
  0x18   :  { %v111_v13 = vunpack.c.0.s8 %v110_v4  ;;  %v4417_v14 = vld [vmem:[%s5634_s1 + $0x14] ss:$8 sps:$4 sm:$0xff]   ;;  %vm280_vm11 = vcmask 1046534   ;;  %vm385_vm12 = vsmask.f32 256  ;;  %215 = vmatpush1.bf16.msra.mxu1 %v4413_v9  ;;  %142 = vmatprep.subr.bf16.mxu0 %v4414_v11  ;;  %vm4998_vm14 = vmor %vm4956_vm6, %vm73_vm8 }
  0x19   :  { %v4419_v15 = vld [vmem:[%s5634_s1 + $0x10] ss:$8 sps:$4 sm:$0xff]   ;;  %vm387_vm13 = vsmask.f32 4352  ;;  %216 = vmatprep.subr.bf16.mxu1 %v4417_v14  ;;  %v4422_v16 = vld [vmem:[%s5634_s1 + $0x44] ss:$8 sps:$4 sm:$0xff]   ;;  %vm5011_vm0 = vmor %vm4962_vm7, %vm278_vm10 }
  0x1a   :  { %vm396_vm15 = vsmask.f32 7946  ;;  %v3848_v18 = vld.sshfl [vmem:[%s5633_s0] sm:$0x13 pattern:$0x76325410]  ;;  %v5006_v19 = vsub.s32 %v111_v13, %v4978_v10  ;;  %vm5020_vm1 = vmand %vm275_vm4, %vm385_vm12 }
  0x1b   :  { %143 = vmatpush1.bf16.msra.mxu0 %v4416_v12  ;;  %v3849_v21 = vld.sshfl [vmem:[%s5633_s0 + $0x4] sm:$0x13 pattern:$0x76325410]  ;;  %v59_v22 = vcombine.high %v3848_v18, %v3848_v18  ;;  %v76_v23 = vshrl.u32 %v3848_v18, 16  ;;  %v79_v24 = vshll.u32 %v3848_v18, 16  ;;  %vm5029_vm2 = vmand %vm278_vm10, %vm387_vm13 }
  0x1c   :  { %326 = vmatprep.subr.bf16.mxu0 %v4422_v16  ;;  %217 = vmatpush1.bf16.msra.mxu1 %v4419_v15  ;;  %v67_v26 = vcombine.high %v3849_v21, %v3849_v21  ;;  %v90_v27 = vshrl.u32 %v3849_v21, 16  ;;  %v93_v28 = vshll.u32 %v3849_v21, 16  ;;  %v4845_v29 = vld.sshfl [vmem:[%s5633_s0] sm:$0xf pattern:$0x76325410]  ;;  %vm389_vm4 = vmor %vm5029_vm2, %vm5020_vm1 }
  0x1d   :  { %v78_v30 = vrot.slane %v76_v23, 6  ;;  %v81_v31 = vrot.slane %v79_v24, 7  ;;  %v85_v32 = vshll.u32 %v59_v22, 16  ;;  %vm398_vm3 = vsmask.f32 7962  ;;  %vm5042_vm6 = vmand %vm276_vm5, %vm396_vm15 }
  0x1e   :  { %v92_v34 = vrot.slane %v90_v27, 6  ;;  %v95_v35 = vrot.slane %v93_v28, 7  ;;  %v99_v36 = vshll.u32 %v67_v26, 16  ;;  %vm5052_vm7 = vmand %vm280_vm11, %vm398_vm3  ;;  %v390_v50 = vld [vmem:[#allocation2] sm:$0x11]  ;;  %vm3831_vm1 = vcmask 386048  }
  0x1f   :  { %v82_v37 = vor.u32 %v81_v31, %v78_v30  ;;  %v87_v38 = vrot.slane %v85_v32, 7  ;;  %v3864_v39 = vld.sshfl [vmem:[%s5633_s0] sm:$0x12 pattern:$0x76325410]  ;;  %3863 = vmatmul.mubr.msk.bf16.vlgmr.msra.gmra.mrb[0].mxu1 %vm136_vm9, %v4845_v29  ;;  %vm400_vm5 = vmor %vm5052_vm7, %vm5042_vm6  ;;  %v391_v54 = vsel %vm389_vm4, 0, %v390_v50 }
  0x20   :  { %v96_v41 = vor.u32 %v95_v35, %v92_v34  ;;  %v101_v42 = vrot.slane %v99_v36, 7  ;;  %v3865_v43 = vld.sshfl [vmem:[%s5633_s0 + $0x4] sm:$0x12 pattern:$0x76325410]  ;;  %v266_v44 = vcombine.high %v3864_v39, %v3864_v39  ;;  %v3866_v45 = vrot.slane %v3864_v39, 9  ;;  %vm5075_vm8 = vmor %vm5011_vm0, %vm280_vm11 }
  0x21   :  { %v83_v47 = vrot.slane %v82_v37, 2  ;;  %v274_v48 = vcombine.high %v3865_v43, %v3865_v43  ;;  %v3867_v49 = vrot.slane %v3865_v43, 9  ;;  %v393_v51 = vld [vmem:[#allocation2 + $0x8] sm:$0x11]  ;;  %v401_v56 = vld [vmem:[#allocation2] sm:$0x44] }
  0x22   :  { %v97_v52 = vrot.slane %v96_v41, 2  ;;  %v284_v53 = vrot.slane %v266_v44, 7  ;;  %v394_v55 = vsel %vm389_vm4, 0, %v393_v51  ;;  %392 = vst [vmem:[#allocation2] sm:$0x11] %v391_v54  ;;  %v402_v60 = vsel %vm400_vm5, 0, %v401_v56 }
  0x23   :  { %v88_v57 = vsel %vm4998_vm14, %v83_v47, %v87_v38  ;;  %v288_v59 = vrot.slane %v274_v48, 7  ;;  %395 = vst [vmem:[#allocation2 + $0x8] sm:$0x11] %v394_v55  ;;  %v404_v61 = vld [vmem:[#allocation2 + $0x8] sm:$0x44]  ;;  %vm450_vm11 = vcmask 1046532  }
  0x24   :  { %v4427_v62 = vld [vmem:[#allocation4 + $0x200] ss:$16 sps:$4 sm:$0xff]   ;;  %v102_v63 = vsel %vm4998_vm14, %v97_v52, %v101_v42  ;;  %403 = vst [vmem:[#allocation2] sm:$0x44] %v402_v60  ;;  %v405_v1 = vsel %vm400_vm5, 0, %v404_v61  ;;  %v285_v5 = vsel %vm5075_vm8, %v3866_v45, %v284_v53 }
  0x25   :  { %v4429_v2 = vld [vmem:[#allocation4 + $0x204] ss:$16 sps:$4 sm:$0xff]   ;;  %v108_v3 = vcombine.low %v88_v57, %v102_v63  ;;  %406 = vst [vmem:[#allocation2 + $0x8] sm:$0x44] %v405_v1  ;;  %v4420_v4 = vld [vmem:[%s5634_s1 + $0x40] ss:$8 sps:$4 sm:$0xff]   ;;  %v289_v6 = vsel %vm5075_vm8, %v3867_v49, %v288_v59 }
  0x26   :  { %986 = vmatprep.subr.bf16.mxu1 %v4429_v2  ;;  %v4435_v7 = vld [vmem:[#allocation4 + $0x224] ss:$16 sps:$4 sm:$0xff]   ;;  %v4433_v11 = vld [vmem:[#allocation4 + $0x220] ss:$16 sps:$4 sm:$0xff]   ;;  %v295_v12 = vcombine.low %v285_v5, %v289_v6  ;;  %v4432_v15 = vld [vmem:[#allocation4 + $0x20c] ss:$16 sps:$4 sm:$0xff]  }
  0x27   :  { %v115_v8 = vrot.slane %v108_v3, %v5006_v19  ;;  %v4426_v9 = vld [vmem:[%s5634_s1 + $0x54] ss:$8 sps:$4 sm:$0xff]   ;;  %987 = vmatpush1.bf16.msra.mxu1 %v4427_v62  ;;  %v4424_v14 = vld [vmem:[%s5634_s1 + $0x50] ss:$8 sps:$4 sm:$0xff]   ;;  %vm448_vm10 = vsmask.f32 2306 }
  0x28   :  { %988 = vmatprep.subr.bf16.mxu1 %v4435_v7  ;;  %v4441_v13 = vld [vmem:[#allocation4 + $0x244] ss:$16 sps:$4 sm:$0xff]   ;;  %v4439_v16 = vld [vmem:[#allocation4 + $0x240] ss:$16 sps:$4 sm:$0xff]   ;;  %v4430_v18 = vld [vmem:[#allocation4 + $0x208] ss:$16 sps:$4 sm:$0xff]   ;;  %v302_v21 = vrot.slane %v295_v12, %v5006_v19 }
  0x29   :  { %3858 = vmatmul.mubr.msk.bf16.vlgmr.msra.gmra.mrb[0].mxu0 %vm136_vm9, %v115_v8  ;;  %v4447_v20 = vld [vmem:[#allocation4 + $0x264] ss:$16 sps:$4 sm:$0xff]   ;;  %v4438_v22 = vld [vmem:[#allocation4 + $0x22c] ss:$16 sps:$4 sm:$0xff]   ;;  %v4445_v23 = vld [vmem:[#allocation4 + $0x260] ss:$16 sps:$4 sm:$0xff]  }
  0x2a   :  { %327 = vmatpush1.bf16.msra.mxu0 %v4420_v4  ;;  %358 = vmatprep.mubr.bf16.mxu0 %v4897_v0  ;;  %v4436_v24 = vld [vmem:[#allocation4 + $0x228] ss:$16 sps:$4 sm:$0xff]   ;;  %v4444_v25 = vld [vmem:[#allocation4 + $0x24c] ss:$16 sps:$4 sm:$0xff]   ;;  %v4453_v28 = vld [vmem:[#allocation4 + $0x284] ss:$16 sps:$4 sm:$0xff]  }
  0x2b   :  { %328 = vmatprep.subr.bf16.mxu0 %v4426_v9  ;;  %989 = vmatpush1.bf16.msra.mxu1 %v4433_v11  ;;  %v4442_v0 = vld [vmem:[#allocation4 + $0x248] ss:$16 sps:$4 sm:$0xff]   ;;  %v4450_v26 = vld [vmem:[#allocation4 + $0x26c] ss:$16 sps:$4 sm:$0xff]   ;;  %v4451_v30 = vld [vmem:[#allocation4 + $0x280] ss:$16 sps:$4 sm:$0xff]  }
  0x2c   :  { %990 = vmatprep.subr.bf16.mxu1 %v4441_v13  ;;  %v4448_v27 = vld [vmem:[#allocation4 + $0x268] ss:$16 sps:$4 sm:$0xff]   ;;  %v4456_v29 = vld [vmem:[#allocation4 + $0x28c] ss:$16 sps:$4 sm:$0xff]   ;;  %v4457_v32 = vld [vmem:[#allocation4 + $0x2a0] ss:$16 sps:$4 sm:$0xff]  }
  0x2d   :  { %v4454_v31 = vld [vmem:[#allocation4 + $0x288] ss:$16 sps:$4 sm:$0xff]   ;;  %v4459_v33 = vld [vmem:[#allocation4 + $0x2a4] ss:$16 sps:$4 sm:$0xff]   ;;  %v4462_v35 = vld [vmem:[#allocation4 + $0x2ac] ss:$16 sps:$4 sm:$0xff]  }
  0x2e   :  { %329 = vmatpush1.bf16.msra.mxu0 %v4424_v14  ;;  %v4460_v34 = vld [vmem:[#allocation4 + $0x2a8] ss:$16 sps:$4 sm:$0xff]   ;;  %v4465_v36 = vld [vmem:[#allocation4 + $0x2c4] ss:$16 sps:$4 sm:$0xff]   ;;  %v4463_v37 = vld [vmem:[#allocation4 + $0x2c0] ss:$16 sps:$4 sm:$0xff]  }
  0x2f   :  { %1027 = vmatprep.subr.bf16.mxu0 %v4432_v15  ;;  %991 = vmatpush1.bf16.msra.mxu1 %v4439_v16  ;;  %v4466_v38 = vld [vmem:[#allocation4 + $0x2c8] ss:$16 sps:$4 sm:$0xff]   ;;  %v4468_v39 = vld [vmem:[#allocation4 + $0x2cc] ss:$16 sps:$4 sm:$0xff]   ;;  %v4471_v40 = vld [vmem:[#allocation4 + $0x2e4] ss:$16 sps:$4 sm:$0xff]  }
  0x30   :  { %992 = vmatprep.subr.bf16.mxu1 %v4447_v20  ;;  %v4474_v41 = vld [vmem:[#allocation4 + $0x2ec] ss:$16 sps:$4 sm:$0xff]   ;;  %v4469_v42 = vld [vmem:[#allocation4 + $0x2e0] ss:$16 sps:$4 sm:$0xff]   ;;  %v4472_v43 = vld [vmem:[#allocation4 + $0x2e8] ss:$16 sps:$4 sm:$0xff]  }
  0x31   :  { %3876 = vmatmul.mubr.msk.bf16.vlgmr.msra.gmra.mrb[4].mxu0 %vm136_vm9, %v302_v21  ;;  %v4477_v44 = vld [vmem:[#allocation4 + $0x304] ss:$16 sps:$4 sm:$0xff]   ;;  %v4480_v45 = vld [vmem:[#allocation4 + $0x30c] ss:$16 sps:$4 sm:$0xff]   ;;  %v4475_v46 = vld [vmem:[#allocation4 + $0x300] ss:$16 sps:$4 sm:$0xff]  }
  0x32   :  { %1028 = vmatpush1.bf16.msra.mxu0 %v4430_v18  ;;  %v4478_v47 = vld [vmem:[#allocation4 + $0x308] ss:$16 sps:$4 sm:$0xff]   ;;  %v4483_v48 = vld [vmem:[#allocation4 + $0x324] ss:$16 sps:$4 sm:$0xff]   ;;  %v4486_v49 = vld [vmem:[#allocation4 + $0x32c] ss:$16 sps:$4 sm:$0xff]  }
  0x33   :  { %1029 = vmatprep.subr.bf16.mxu0 %v4438_v22  ;;  %993 = vmatpush1.bf16.msra.mxu1 %v4445_v23  ;;  %v4481_v50 = vld [vmem:[#allocation4 + $0x320] ss:$16 sps:$4 sm:$0xff]   ;;  %v4484_v51 = vld [vmem:[#allocation4 + $0x328] ss:$16 sps:$4 sm:$0xff]   ;;  %v4489_v52 = vld [vmem:[#allocation4 + $0x344] ss:$16 sps:$4 sm:$0xff]  }
  0x34   :  { %994 = vmatprep.subr.bf16.mxu1 %v4453_v28  ;;  %v4487_v53 = vld [vmem:[#allocation4 + $0x340] ss:$16 sps:$4 sm:$0xff]   ;;  %v4490_v54 = vld [vmem:[#allocation4 + $0x348] ss:$16 sps:$4 sm:$0xff]   ;;  %v4492_v55 = vld [vmem:[#allocation4 + $0x34c] ss:$16 sps:$4 sm:$0xff]  }
  0x35   :  { %v4493_v56 = vld [vmem:[#allocation4 + $0x360] ss:$16 sps:$4 sm:$0xff]   ;;  %v4495_v57 = vld [vmem:[#allocation4 + $0x364] ss:$16 sps:$4 sm:$0xff]   ;;  %v4498_v59 = vld [vmem:[#allocation4 + $0x36c] ss:$16 sps:$4 sm:$0xff]  }
  0x36   :  { %1030 = vmatpush1.bf16.msra.mxu0 %v4436_v24  ;;  %v4501_v60 = vld [vmem:[#allocation4 + $0x384] ss:$16 sps:$4 sm:$0xff]   ;;  %v4496_v61 = vld [vmem:[#allocation4 + $0x368] ss:$16 sps:$4 sm:$0xff]   ;;  %v4504_v62 = vld [vmem:[#allocation4 + $0x38c] ss:$16 sps:$4 sm:$0xff]  }
  0x37   :  { %1031 = vmatprep.subr.bf16.mxu0 %v4444_v25  ;;  %995 = vmatpush1.bf16.msra.mxu1 %v4451_v30  ;;  %v4499_v63 = vld [vmem:[#allocation4 + $0x380] ss:$16 sps:$4 sm:$0xff]   ;;  %v4502_v1 = vld [vmem:[#allocation4 + $0x388] ss:$16 sps:$4 sm:$0xff]   ;;  %v4507_v2 = vld [vmem:[#allocation4 + $0x3a4] ss:$16 sps:$4 sm:$0xff]  }
  0x38   :  { %996 = vmatprep.subr.bf16.mxu1 %v4459_v33  ;;  %v4505_v3 = vld [vmem:[#allocation4 + $0x3a0] ss:$16 sps:$4 sm:$0xff]   ;;  %v4510_v4 = vld [vmem:[#allocation4 + $0x3ac] ss:$16 sps:$4 sm:$0xff]   ;;  %v4513_v5 = vld [vmem:[#allocation4 + $0x3c4] ss:$16 sps:$4 sm:$0xff]  }
  0x39   :  { %v4508_v6 = vld [vmem:[#allocation4 + $0x3a8] ss:$16 sps:$4 sm:$0xff]   ;;  %v4516_v7 = vld [vmem:[#allocation4 + $0x3cc] ss:$16 sps:$4 sm:$0xff]   ;;  %v4511_v8 = vld [vmem:[#allocation4 + $0x3c0] ss:$16 sps:$4 sm:$0xff]  }
  0x3a   :  { %1032 = vmatpush1.bf16.msra.mxu0 %v4442_v0  ;;  %v4519_v9 = vld [vmem:[#allocation4 + $0x3e4] ss:$16 sps:$4 sm:$0xff]   ;;  %v4514_v11 = vld [vmem:[#allocation4 + $0x3c8] ss:$16 sps:$4 sm:$0xff]   ;;  %v4522_v12 = vld [vmem:[#allocation4 + $0x3ec] ss:$16 sps:$4 sm:$0xff]  }
  0x3b   :  { %1033 = vmatprep.subr.bf16.mxu0 %v4450_v26  ;;  %997 = vmatpush1.bf16.msra.mxu1 %v4457_v32  ;;  %v4517_v13 = vld [vmem:[#allocation4 + $0x3e0] ss:$16 sps:$4 sm:$0xff]   ;;  %v4520_v14 = vld [vmem:[#allocation4 + $0x3e8] ss:$16 sps:$4 sm:$0xff]   ;;  %v4525_v15 = vld [vmem:[#allocation4 + $0x4] ss:$16 sps:$4 sm:$0xff]  }
  0x3c   :  { %998 = vmatprep.subr.bf16.mxu1 %v4465_v36  ;;  %v4528_v16 = vld [vmem:[#allocation4 + $0xc] ss:$16 sps:$4 sm:$0xff]   ;;  %v373_v28 = vsub.s32 0, %v4978_v10  ;;  %v377_v30 = vsub.s32 1, %v4978_v10  ;;  %vm447_vm9 = vcmask 1042432  }
  0x3d   :  { %vm451_vm12 = vsmask.f32 6418  ;;  %vm449_vm13 = vmand %vm447_vm9, %vm448_vm10 }
  0x3e   :  { %1034 = vmatpush1.bf16.msra.mxu0 %v4448_v27  ;;  %vm452_vm15 = vmand %vm450_vm11, %vm451_vm12 }
  0x3f   :  { %1035 = vmatprep.subr.bf16.mxu0 %v4456_v29  ;;  %999 = vmatpush1.bf16.msra.mxu1 %v4463_v37  ;;  %v369_v29 = vld [vmem:[%s5635_s2] sm:$0x3]  ;;  %vm453_vm0 = vmor %vm452_vm15, %vm449_vm13 }
  0x40   :  { %1000 = vmatprep.subr.bf16.mxu1 %v4471_v40  ;;  %v378_v33 = vrot.slane %v369_v29, %v377_v30 }
  0x42   :  { %1036 = vmatpush1.bf16.msra.mxu0 %v4454_v31  ;;  %v374_v31 = vrot.slane %v369_v29, %v373_v28 }
  0x43   :  { %1037 = vmatprep.subr.bf16.mxu0 %v4462_v35  ;;  %1001 = vmatpush1.bf16.msra.mxu1 %v4469_v42 }
  0x44   :  { %1002 = vmatprep.subr.bf16.mxu1 %v4477_v44 }
  0x46   :  { %1038 = vmatpush1.bf16.msra.mxu0 %v4460_v34 }
  0x47   :  { %1039 = vmatprep.subr.bf16.mxu0 %v4468_v39  ;;  %1003 = vmatpush1.bf16.msra.mxu1 %v4475_v46 }
  0x48   :  { %1004 = vmatprep.subr.bf16.mxu1 %v4483_v48 }
  0x4a   :  { %1040 = vmatpush1.bf16.msra.mxu0 %v4466_v38 }
  0x4b   :  { %1041 = vmatprep.subr.bf16.mxu0 %v4474_v41  ;;  %1005 = vmatpush1.bf16.msra.mxu1 %v4481_v50 }
  0x4c   :  { %1006 = vmatprep.subr.bf16.mxu1 %v4489_v52 }
  0x4e   :  { %1042 = vmatpush1.bf16.msra.mxu0 %v4472_v43 }
  0x4f   :  { %1043 = vmatprep.subr.bf16.mxu0 %v4480_v45  ;;  %1007 = vmatpush1.bf16.msra.mxu1 %v4487_v53 }
  0x50   :  { %1008 = vmatprep.subr.bf16.mxu1 %v4495_v57 }
  0x52   :  { %1044 = vmatpush1.bf16.msra.mxu0 %v4478_v47 }
  0x53   :  { %1045 = vmatprep.subr.bf16.mxu0 %v4486_v49  ;;  %1009 = vmatpush1.bf16.msra.mxu1 %v4493_v56  ;;  %v457_v56 = vld [vmem:[#allocation2 + $0x8] sm:$0x77] }
  0x54   :  { %1010 = vmatprep.subr.bf16.mxu1 %v4501_v60 }
  0x56   :  { %1046 = vmatpush1.bf16.msra.mxu0 %v4484_v51 }
  0x57   :  { %1047 = vmatprep.subr.bf16.mxu0 %v4492_v55  ;;  %1011 = vmatpush1.bf16.msra.mxu1 %v4499_v63  ;;  %v454_v55 = vld [vmem:[#allocation2] sm:$0x77] }
  0x58   :  { %1012 = vmatprep.subr.bf16.mxu1 %v4507_v2 }
  0x5a   :  { %1048 = vmatpush1.bf16.msra.mxu0 %v4490_v54 }
  0x5b   :  { %1049 = vmatprep.subr.bf16.mxu0 %v4498_v59  ;;  %1013 = vmatpush1.bf16.msra.mxu1 %v4505_v3 }
  0x5c   :  { %1014 = vmatprep.subr.bf16.mxu1 %v4513_v5 }
  0x5e   :  { %1050 = vmatpush1.bf16.msra.mxu0 %v4496_v61 }
  0x5f   :  { %1051 = vmatprep.subr.bf16.mxu0 %v4504_v62  ;;  %1015 = vmatpush1.bf16.msra.mxu1 %v4511_v8 }
  0x60   :  { %1016 = vmatprep.subr.bf16.mxu1 %v4519_v9 }
  0x62   :  { %1052 = vmatpush1.bf16.msra.mxu0 %v4502_v1 }
  0x63   :  { %1053 = vmatprep.subr.bf16.mxu0 %v4510_v4  ;;  %1017 = vmatpush1.bf16.msra.mxu1 %v4517_v13 }
  0x64   :  { %1399 = vmatprep.subr.bf16.mxu1 %v4525_v15 }
  0x66   :  { %1054 = vmatpush1.bf16.msra.mxu0 %v4508_v6 }
  0x67   :  { %1055 = vmatprep.subr.bf16.mxu0 %v4516_v7 }
  0x6a   :  { %1056 = vmatpush1.bf16.msra.mxu0 %v4514_v11 }
  0x6b   :  { %1057 = vmatprep.subr.bf16.mxu0 %v4522_v12 }
  0x6e   :  { %1058 = vmatpush1.bf16.msra.mxu0 %v4520_v14 }
  0x6f   :  { %1440 = vmatprep.subr.bf16.mxu0 %v4528_v16 }
  0xf2   :  { %v248_v18 = vpop.f32.mrb[0].mxu1 }
  0xf3   :  { %v250_v20 = vpop.f32.mrb[1].mxu1 }
  0xf4   :  { %v252_v21 = vpop.f32.mrb[2].mxu1 }
  0xf5   :  { %v253_v22 = vpop.f32.mrb[3].mxu1 }
  0xfc   :  { %v174_v23 = vpop.f32.mrb[0].mxu0 }
  0xfd   :  { %v249_v24 = vadd.f32 %v248_v18, %v174_v23  ;;  %v176_v25 = vpop.f32.mrb[1].mxu0 }
  0xfe   :  { %v251_v0 = vadd.f32 %v250_v20, %v176_v25  ;;  %v178_v26 = vpop.f32.mrb[2].mxu0 }
  0xff   :  { %v179_v27 = vpop.f32.mrb[3].mxu0 }
 0x104   :  { %v360_v32 = vpop.f32.mrb[4].mxu0 }
 0x105   :  { %v367_v34 = vadd.f32 %v360_v32, %v249_v24  ;;  %v362_v35 = vpop.f32.mrb[5].mxu0  ;;  %v4523_v32 = vld [vmem:[#allocation4] ss:$16 sps:$4 sm:$0xff]  }
 0x106   :  { %v368_v36 = vadd.f32 %v362_v35, %v251_v0  ;;  %v364_v37 = vpop.f32.mrb[6].mxu0  ;;  %v4534_v35 = vld [vmem:[#allocation4 + $0x2c] ss:$16 sps:$4 sm:$0xff]  }
 0x107   :  { %v381_v38 = vadd.f32 %v374_v31, %v367_v34  ;;  %v365_v39 = vpop.f32.mrb[7].mxu0  ;;  %v4531_v34 = vld [vmem:[#allocation4 + $0x24] ss:$16 sps:$4 sm:$0xff]   ;;  %v4532_v37 = vld [vmem:[#allocation4 + $0x28] ss:$16 sps:$4 sm:$0xff]  }
 0x108   :  { %v382_v40 = vadd.f32 %v378_v33, %v368_v36  ;;  %v4526_v33 = vld [vmem:[#allocation4 + $0x8] ss:$16 sps:$4 sm:$0xff]   ;;  %v4529_v36 = vld [vmem:[#allocation4 + $0x20] ss:$16 sps:$4 sm:$0xff]   ;;  %v4540_v39 = vld [vmem:[#allocation4 + $0x4c] ss:$16 sps:$4 sm:$0xff]  }
 0x109   :  { %v383_v41 = vmax.f32 %v381_v38, 0.0  ;;  %v4537_v38 = vld [vmem:[#allocation4 + $0x44] ss:$16 sps:$4 sm:$0xff]  }
 0x10a   :  { %v384_v42 = vmax.f32 %v382_v40, 0.0  ;;  %v4535_v40 = vld [vmem:[#allocation4 + $0x40] ss:$16 sps:$4 sm:$0xff]  }
 0x10c   :  { %v409_v43 = vcombine.low %v383_v41, %v384_v42  ;;  %v410_v44 = vcombine.high %v383_v41, %v384_v42  ;;  %v3877_v45 = vcombine.low %v384_v42, %v384_v42  ;;  %v3878_v46 = vcombine.high %v384_v42, %v384_v42  ;;  %v4538_v41 = vld [vmem:[#allocation4 + $0x48] ss:$16 sps:$4 sm:$0xff]   ;;  %v4543_v42 = vld [vmem:[#allocation4 + $0x64] ss:$16 sps:$4 sm:$0xff]  }
 0x10e   :  { %v4222_v47 = vpack.c.bf16 %v3877_v45, %v409_v43  ;;  %v4223_v48 = vpack.c.bf16 %v3878_v46, %v410_v44  ;;  %v4546_v43 = vld [vmem:[#allocation4 + $0x6c] ss:$16 sps:$4 sm:$0xff]   ;;  %v4541_v44 = vld [vmem:[#allocation4 + $0x60] ss:$16 sps:$4 sm:$0xff]   ;;  %v4544_v45 = vld [vmem:[#allocation4 + $0x68] ss:$16 sps:$4 sm:$0xff]  }
 0x10f   :  { %v4549_v46 = vld [vmem:[#allocation4 + $0x84] ss:$16 sps:$4 sm:$0xff]  }
 0x110   :  { %v432_v49 = vshrl.u32 %v4222_v47, 16  ;;  %v439_v50 = vshrl.u32 %v4223_v48, 16  ;;  %v435_v52 = vshll.u32 %v4222_v47, 16  ;;  %v442_v54 = vshll.u32 %v4223_v48, 16  ;;  %v4552_v47 = vld [vmem:[#allocation4 + $0x8c] ss:$16 sps:$4 sm:$0xff]  }
 0x111   :  { %v4547_v48 = vld [vmem:[#allocation4 + $0x80] ss:$16 sps:$4 sm:$0xff]  }
 0x112   :  { %v434_v51 = vrot.slane %v432_v49, 7  ;;  %v441_v53 = vrot.slane %v439_v50, 7  ;;  %v4550_v49 = vld [vmem:[#allocation4 + $0x88] ss:$16 sps:$4 sm:$0xff]   ;;  %v4555_v50 = vld [vmem:[#allocation4 + $0xa4] ss:$16 sps:$4 sm:$0xff]  }
 0x114   :  { %v437_v57 = vor.u32 %v435_v52, %v434_v51  ;;  %v444_v59 = vor.u32 %v442_v54, %v441_v53  ;;  %v4558_v51 = vld [vmem:[#allocation4 + $0xac] ss:$16 sps:$4 sm:$0xff]   ;;  %v4553_v52 = vld [vmem:[#allocation4 + $0xa0] ss:$16 sps:$4 sm:$0xff]   ;;  %v4556_v53 = vld [vmem:[#allocation4 + $0xa8] ss:$16 sps:$4 sm:$0xff]  }
 0x115   :  { %v4561_v54 = vld [vmem:[#allocation4 + $0xc4] ss:$16 sps:$4 sm:$0xff]  }
 0x116   :  { %v455_v60 = vsel %vm453_vm0, %v437_v57, %v454_v55  ;;  %v458_v61 = vsel %vm453_vm0, %v444_v59, %v457_v56  ;;  %v4564_v55 = vld [vmem:[#allocation4 + $0xcc] ss:$16 sps:$4 sm:$0xff]   ;;  %v4559_v56 = vld [vmem:[#allocation4 + $0xc0] ss:$16 sps:$4 sm:$0xff]   ;;  %v4562_v57 = vld [vmem:[#allocation4 + $0xc8] ss:$16 sps:$4 sm:$0xff]  }
 0x117   :  { %456 = vst [vmem:[#allocation2] sm:$0x77] %v455_v60  ;;  %459 = vst [vmem:[#allocation2 + $0x8] sm:$0x77] %v458_v61  ;;  %v4567_v59 = vld [vmem:[#allocation4 + $0xe4] ss:$16 sps:$4 sm:$0xff]  }
 0x118   :  { %v4570_v60 = vld [vmem:[#allocation4 + $0xec] ss:$16 sps:$4 sm:$0xff]   ;;  %v4565_v61 = vld [vmem:[#allocation4 + $0xe0] ss:$16 sps:$4 sm:$0xff]  }
 0x11e   :  { %v3883_v62 = vld.sshfl [vmem:[#allocation2] sm:$0x5f pattern:$0x76325410] }
 0x11f   :  { %v3884_v63 = vld.sshfl [vmem:[#allocation2 + $0x8] sm:$0x5f pattern:$0x76325410]  ;;  %v553_v1 = vcombine.high %v3883_v62, %v3883_v62  ;;  %v563_v2 = vshrl.u32 %v3883_v62, 16  ;;  %v566_v3 = vshll.u32 %v3883_v62, 16 }
 0x120   :  { %v561_v4 = vcombine.high %v3884_v63, %v3884_v63  ;;  %v577_v5 = vshrl.u32 %v3884_v63, 16  ;;  %v580_v6 = vshll.u32 %v3884_v63, 16  ;;  %v3881_v16 = vld.sshfl [vmem:[#allocation2] sm:$0xf pattern:$0x76325410] }
 0x121   :  { %v565_v7 = vrot.slane %v563_v2, 6  ;;  %v568_v8 = vrot.slane %v566_v3, 7  ;;  %v572_v9 = vshll.u32 %v553_v1, 16  ;;  %v4568_v62 = vld [vmem:[#allocation4 + $0xe8] ss:$16 sps:$4 sm:$0xff]  }
 0x122   :  { %v579_v11 = vrot.slane %v577_v5, 6  ;;  %v582_v12 = vrot.slane %v580_v6, 7  ;;  %v586_v13 = vshll.u32 %v561_v4, 16  ;;  %v4573_v63 = vld [vmem:[#allocation4 + $0x104] ss:$16 sps:$4 sm:$0xff]  }
 0x123   :  { %v569_v14 = vor.u32 %v568_v8, %v565_v7  ;;  %v574_v20 = vrot.slane %v572_v9, 7  ;;  %v3882_v21 = vld.sshfl [vmem:[#allocation2 + $0x8] sm:$0xf pattern:$0x76325410] }
 0x124   :  { %v583_v15 = vor.u32 %v582_v12, %v579_v11  ;;  %v588_v23 = vrot.slane %v586_v13, 7  ;;  %v1068_v0 = vcombine.low %v3881_v16, %v3882_v21  ;;  %v4576_v1 = vld [vmem:[#allocation4 + $0x10c] ss:$16 sps:$4 sm:$0xff]   ;;  %v4571_v2 = vld [vmem:[#allocation4 + $0x100] ss:$16 sps:$4 sm:$0xff]  }
 0x125   :  { %v570_v18 = vrot.slane %v569_v14, 2  ;;  %v4574_v3 = vld [vmem:[#allocation4 + $0x108] ss:$16 sps:$4 sm:$0xff]   ;;  %v4579_v4 = vld [vmem:[#allocation4 + $0x124] ss:$16 sps:$4 sm:$0xff]  }
 0x126   :  { %v584_v22 = vrot.slane %v583_v15, 2  ;;  %v5124_v29 = vrot.slane %v1068_v0, %v5006_v19  ;;  %v4582_v5 = vld [vmem:[#allocation4 + $0x12c] ss:$16 sps:$4 sm:$0xff]   ;;  %v4577_v6 = vld [vmem:[#allocation4 + $0x120] ss:$16 sps:$4 sm:$0xff]  }
 0x127   :  { %v575_v24 = vsel %vm4998_vm14, %v570_v18, %v574_v20  ;;  %v4580_v7 = vld [vmem:[#allocation4 + $0x128] ss:$16 sps:$4 sm:$0xff]   ;;  %v4585_v8 = vld [vmem:[#allocation4 + $0x144] ss:$16 sps:$4 sm:$0xff]   ;;  %v4588_v9 = vld [vmem:[#allocation4 + $0x14c] ss:$16 sps:$4 sm:$0xff]  }
 0x128   :  { %v589_v25 = vsel %vm4998_vm14, %v584_v22, %v588_v23  ;;  %v1076_v17 = vcombine.high %v5124_v29, %v5124_v29  ;;  %v4583_v11 = vld [vmem:[#allocation4 + $0x140] ss:$16 sps:$4 sm:$0xff]   ;;  %v4586_v12 = vld [vmem:[#allocation4 + $0x148] ss:$16 sps:$4 sm:$0xff]   ;;  %v4591_v13 = vld [vmem:[#allocation4 + $0x164] ss:$16 sps:$4 sm:$0xff]  }
 0x129   :  { %v655_v26 = vcombine.low %v575_v24, %v589_v25  ;;  %v4594_v14 = vld [vmem:[#allocation4 + $0x16c] ss:$16 sps:$4 sm:$0xff]   ;;  %v4589_v15 = vld [vmem:[#allocation4 + $0x160] ss:$16 sps:$4 sm:$0xff]   ;;  %v4592_v18 = vld [vmem:[#allocation4 + $0x168] ss:$16 sps:$4 sm:$0xff]  }
 0x12a   :  { %v4013_v16 = vld.sshfl [vmem:[#allocation2] sm:$0x5a pattern:$0x76325410]  ;;  %v4600_v22 = vld [vmem:[#allocation4 + $0x18c] ss:$16 sps:$4 sm:$0xff]  }
 0x12b   :  { %v662_v27 = vrot.slane %v655_v26, %v5006_v19  ;;  %v4014_v20 = vld.sshfl [vmem:[#allocation2 + $0x8] sm:$0x5a pattern:$0x76325410]  ;;  %v4597_v21 = vld [vmem:[#allocation4 + $0x184] ss:$16 sps:$4 sm:$0xff]   ;;  %v1492_v23 = vcombine.high %v4013_v16, %v4013_v16 }
 0x12c   :  { %v1500_v24 = vcombine.high %v4014_v20, %v4014_v20  ;;  %v4595_v25 = vld [vmem:[#allocation4 + $0x180] ss:$16 sps:$4 sm:$0xff]   ;;  %v4598_v0 = vld [vmem:[#allocation4 + $0x188] ss:$16 sps:$4 sm:$0xff]   ;;  %v4603_v26 = vld [vmem:[#allocation4 + $0x1a4] ss:$16 sps:$4 sm:$0xff]  }
 0x12d   :  { %v663_v31 = vcombine.high %v662_v27, %v662_v27  ;;  %vm2158_vm14 = vcmask 1041409  }
 0x12f   :  { %1018 = vmatprep.mubr.bf16.mxu1 %v663_v31  ;;  %1059 = vmatprep.mubr.bf16.mxu0 %v663_v31  ;;  %v1503_v31 = vrot.slane %v1492_v23, 7  ;;  %v4675_v23 = vld [vmem:[#allocation4 + $0x524] ss:$16 sps:$4 sm:$0xff]  }
 0x130   :  { %1019 = vmatmul.mubr.bf16.vlgmr.msra.gmra.mrb[4].mxu1 %v662_v27  ;;  %1060 = vmatmul.mubr.bf16.vlgmr.msra.gmra.mrb[8].mxu0 %v662_v27  ;;  %v4606_v27 = vld [vmem:[#allocation4 + $0x1ac] ss:$16 sps:$4 sm:$0xff]  }
 0x131   :  { %1400 = vmatpush1.bf16.msra.mxu1 %v4523_v32  ;;  %1441 = vmatpush1.bf16.msra.mxu0 %v4526_v33  ;;  %v1507_v32 = vrot.slane %v1500_v24, 7  ;;  %v4601_v33 = vld [vmem:[#allocation4 + $0x1a0] ss:$16 sps:$4 sm:$0xff]   ;;  %v4678_v24 = vld [vmem:[#allocation4 + $0x52c] ss:$16 sps:$4 sm:$0xff]  }
 0x132   :  { %1431 = vmatprep.mubr.bf16.mxu1 %v1076_v17  ;;  %1472 = vmatprep.mubr.bf16.mxu0 %v1076_v17  ;;  %v4612_v17 = vld [vmem:[#allocation4 + $0x1cc] ss:$16 sps:$4 sm:$0xff]  }
 0x133   :  { %1401 = vmatprep.subr.bf16.mxu1 %v4531_v34  ;;  %1442 = vmatprep.subr.bf16.mxu0 %v4534_v35  ;;  %v4604_v34 = vld [vmem:[#allocation4 + $0x1a8] ss:$16 sps:$4 sm:$0xff]   ;;  %v4609_v35 = vld [vmem:[#allocation4 + $0x1c4] ss:$16 sps:$4 sm:$0xff]  }
 0x135   :  { %1402 = vmatpush1.bf16.msra.mxu1 %v4529_v36  ;;  %1443 = vmatpush1.bf16.msra.mxu0 %v4532_v37  ;;  %v4015_v36 = vrot.slane %v4013_v16, 9  ;;  %v4016_v37 = vrot.slane %v4014_v20, 9  ;;  %v4664_v16 = vld [vmem:[#allocation4 + $0x4e8] ss:$16 sps:$4 sm:$0xff]   ;;  %v4672_v20 = vld [vmem:[#allocation4 + $0x50c] ss:$16 sps:$4 sm:$0xff]  }
 0x136   :  { %1403 = vmatprep.subr.bf16.mxu1 %v4537_v38  ;;  %1444 = vmatprep.subr.bf16.mxu0 %v4540_v39 }
 0x137   :  { %v1504_v38 = vsel %vm5075_vm8, %v4015_v36, %v1503_v31  ;;  %v1508_v39 = vsel %vm5075_vm8, %v4016_v37, %v1507_v32  ;;  %v4679_v31 = vld [vmem:[#allocation4 + $0x540] ss:$16 sps:$4 sm:$0xff]   ;;  %v4682_v32 = vld [vmem:[#allocation4 + $0x548] ss:$16 sps:$4 sm:$0xff]   ;;  %v4693_v36 = vld [vmem:[#allocation4 + $0x584] ss:$16 sps:$4 sm:$0xff]  }
 0x138   :  { %v4696_v37 = vld [vmem:[#allocation4 + $0x58c] ss:$16 sps:$4 sm:$0xff]  }
 0x139   :  { %1404 = vmatpush1.bf16.msra.mxu1 %v4535_v40  ;;  %1445 = vmatpush1.bf16.msra.mxu0 %v4538_v41  ;;  %v4607_v40 = vld [vmem:[#allocation4 + $0x1c0] ss:$16 sps:$4 sm:$0xff]   ;;  %v4610_v41 = vld [vmem:[#allocation4 + $0x1c8] ss:$16 sps:$4 sm:$0xff]  }
 0x13a   :  { %1405 = vmatprep.subr.bf16.mxu1 %v4543_v42  ;;  %1446 = vmatprep.subr.bf16.mxu0 %v4546_v43  ;;  %v4615_v42 = vld [vmem:[#allocation4 + $0x1e4] ss:$16 sps:$4 sm:$0xff]   ;;  %v4618_v43 = vld [vmem:[#allocation4 + $0x1ec] ss:$16 sps:$4 sm:$0xff]  }
 0x13d   :  { %1406 = vmatpush1.bf16.msra.mxu1 %v4541_v44  ;;  %1447 = vmatpush1.bf16.msra.mxu0 %v4544_v45  ;;  %v1574_v44 = vcombine.low %v1504_v38, %v1508_v39  ;;  %v4613_v45 = vld [vmem:[#allocation4 + $0x1e0] ss:$16 sps:$4 sm:$0xff]   ;;  %v4694_v39 = vld [vmem:[#allocation4 + $0x588] ss:$16 sps:$4 sm:$0xff]  }
 0x13e   :  { %1407 = vmatprep.subr.bf16.mxu1 %v4549_v46  ;;  %1448 = vmatprep.subr.bf16.mxu0 %v4552_v47  ;;  %v4616_v46 = vld [vmem:[#allocation4 + $0x1e8] ss:$16 sps:$4 sm:$0xff]   ;;  %v4621_v47 = vld [vmem:[#allocation4 + $0x404] ss:$16 sps:$4 sm:$0xff]   ;;  %v4691_v38 = vld [vmem:[#allocation4 + $0x580] ss:$16 sps:$4 sm:$0xff]  }
 0x13f   :  { %v5133_v58 = vrot.slane %v1574_v44, %v5006_v19  ;;  %v4628_v19 = vld [vmem:[#allocation4 + $0x428] ss:$16 sps:$4 sm:$0xff]   ;;  %v4705_v44 = vld [vmem:[#allocation4 + $0x5c4] ss:$16 sps:$4 sm:$0xff]  }
 0x141   :  { %1408 = vmatpush1.bf16.msra.mxu1 %v4547_v48  ;;  %1449 = vmatpush1.bf16.msra.mxu0 %v4550_v49  ;;  %v4624_v48 = vld [vmem:[#allocation4 + $0x40c] ss:$16 sps:$4 sm:$0xff]   ;;  %v4619_v49 = vld [vmem:[#allocation4 + $0x400] ss:$16 sps:$4 sm:$0xff]  }
 0x142   :  { %1409 = vmatprep.subr.bf16.mxu1 %v4555_v50  ;;  %1450 = vmatprep.subr.bf16.mxu0 %v4558_v51  ;;  %v4622_v50 = vld [vmem:[#allocation4 + $0x408] ss:$16 sps:$4 sm:$0xff]   ;;  %v1582_v51 = vcombine.high %v5133_v58, %v5133_v58 }
 0x145   :  { %1410 = vmatpush1.bf16.msra.mxu1 %v4553_v52  ;;  %1451 = vmatpush1.bf16.msra.mxu0 %v4556_v53  ;;  %v4627_v52 = vld [vmem:[#allocation4 + $0x424] ss:$16 sps:$4 sm:$0xff]   ;;  %v4630_v53 = vld [vmem:[#allocation4 + $0x42c] ss:$16 sps:$4 sm:$0xff]  }
 0x146   :  { %1411 = vmatprep.subr.bf16.mxu1 %v4561_v54  ;;  %1452 = vmatprep.subr.bf16.mxu0 %v4564_v55  ;;  %v4625_v54 = vld [vmem:[#allocation4 + $0x420] ss:$16 sps:$4 sm:$0xff]   ;;  %v4633_v55 = vld [vmem:[#allocation4 + $0x444] ss:$16 sps:$4 sm:$0xff]  }
 0x149   :  { %1412 = vmatpush1.bf16.msra.mxu1 %v4559_v56  ;;  %1453 = vmatpush1.bf16.msra.mxu0 %v4562_v57  ;;  %v4636_v56 = vld [vmem:[#allocation4 + $0x44c] ss:$16 sps:$4 sm:$0xff]   ;;  %v4631_v57 = vld [vmem:[#allocation4 + $0x440] ss:$16 sps:$4 sm:$0xff]  }
 0x14a   :  { %1413 = vmatprep.subr.bf16.mxu1 %v4567_v59  ;;  %1454 = vmatprep.subr.bf16.mxu0 %v4570_v60  ;;  %v4634_v59 = vld [vmem:[#allocation4 + $0x448] ss:$16 sps:$4 sm:$0xff]   ;;  %v4639_v60 = vld [vmem:[#allocation4 + $0x464] ss:$16 sps:$4 sm:$0xff]  }
 0x14d   :  { %1414 = vmatpush1.bf16.msra.mxu1 %v4565_v61  ;;  %1455 = vmatpush1.bf16.msra.mxu0 %v4568_v62  ;;  %v4642_v61 = vld [vmem:[#allocation4 + $0x46c] ss:$16 sps:$4 sm:$0xff]   ;;  %v4640_v62 = vld [vmem:[#allocation4 + $0x468] ss:$16 sps:$4 sm:$0xff]  }
 0x14e   :  { %1415 = vmatprep.subr.bf16.mxu1 %v4573_v63  ;;  %1456 = vmatprep.subr.bf16.mxu0 %v4576_v1  ;;  %v4645_v63 = vld [vmem:[#allocation4 + $0x484] ss:$16 sps:$4 sm:$0xff]   ;;  %v4648_v1 = vld [vmem:[#allocation4 + $0x48c] ss:$16 sps:$4 sm:$0xff]  }
 0x151   :  { %1416 = vmatpush1.bf16.msra.mxu1 %v4571_v2  ;;  %1457 = vmatpush1.bf16.msra.mxu0 %v4574_v3  ;;  %v4643_v2 = vld [vmem:[#allocation4 + $0x480] ss:$16 sps:$4 sm:$0xff]   ;;  %v4646_v3 = vld [vmem:[#allocation4 + $0x488] ss:$16 sps:$4 sm:$0xff]  }
 0x152   :  { %1417 = vmatprep.subr.bf16.mxu1 %v4579_v4  ;;  %1458 = vmatprep.subr.bf16.mxu0 %v4582_v5  ;;  %v4651_v4 = vld [vmem:[#allocation4 + $0x4a4] ss:$16 sps:$4 sm:$0xff]   ;;  %v4654_v5 = vld [vmem:[#allocation4 + $0x4ac] ss:$16 sps:$4 sm:$0xff]  }
 0x155   :  { %1418 = vmatpush1.bf16.msra.mxu1 %v4577_v6  ;;  %1459 = vmatpush1.bf16.msra.mxu0 %v4580_v7  ;;  %v4649_v6 = vld [vmem:[#allocation4 + $0x4a0] ss:$16 sps:$4 sm:$0xff]   ;;  %v4652_v7 = vld [vmem:[#allocation4 + $0x4a8] ss:$16 sps:$4 sm:$0xff]  }
 0x156   :  { %1419 = vmatprep.subr.bf16.mxu1 %v4585_v8  ;;  %1460 = vmatprep.subr.bf16.mxu0 %v4588_v9  ;;  %v4657_v8 = vld [vmem:[#allocation4 + $0x4c4] ss:$16 sps:$4 sm:$0xff]   ;;  %v4660_v9 = vld [vmem:[#allocation4 + $0x4cc] ss:$16 sps:$4 sm:$0xff]  }
 0x159   :  { %1420 = vmatpush1.bf16.msra.mxu1 %v4583_v11  ;;  %1461 = vmatpush1.bf16.msra.mxu0 %v4586_v12  ;;  %v4655_v11 = vld [vmem:[#allocation4 + $0x4c0] ss:$16 sps:$4 sm:$0xff]   ;;  %v4658_v12 = vld [vmem:[#allocation4 + $0x4c8] ss:$16 sps:$4 sm:$0xff]  }
 0x15a   :  { %1421 = vmatprep.subr.bf16.mxu1 %v4591_v13  ;;  %1462 = vmatprep.subr.bf16.mxu0 %v4594_v14  ;;  %v4663_v13 = vld [vmem:[#allocation4 + $0x4e4] ss:$16 sps:$4 sm:$0xff]   ;;  %v4666_v14 = vld [vmem:[#allocation4 + $0x4ec] ss:$16 sps:$4 sm:$0xff]  }
 0x15d   :  { %1422 = vmatpush1.bf16.msra.mxu1 %v4589_v15  ;;  %1463 = vmatpush1.bf16.msra.mxu0 %v4592_v18  ;;  %v4661_v15 = vld [vmem:[#allocation4 + $0x4e0] ss:$16 sps:$4 sm:$0xff]   ;;  %v4669_v18 = vld [vmem:[#allocation4 + $0x504] ss:$16 sps:$4 sm:$0xff]  }
 0x15e   :  { %1423 = vmatprep.subr.bf16.mxu1 %v4597_v21  ;;  %1464 = vmatprep.subr.bf16.mxu0 %v4600_v22  ;;  %v4667_v21 = vld [vmem:[#allocation4 + $0x500] ss:$16 sps:$4 sm:$0xff]   ;;  %v4670_v22 = vld [vmem:[#allocation4 + $0x508] ss:$16 sps:$4 sm:$0xff]  }
 0x161   :  { %1424 = vmatpush1.bf16.msra.mxu1 %v4595_v25  ;;  %1465 = vmatpush1.bf16.msra.mxu0 %v4598_v0  ;;  %v4673_v25 = vld [vmem:[#allocation4 + $0x520] ss:$16 sps:$4 sm:$0xff]   ;;  %v4676_v0 = vld [vmem:[#allocation4 + $0x528] ss:$16 sps:$4 sm:$0xff]  }
 0x162   :  { %1425 = vmatprep.subr.bf16.mxu1 %v4603_v26  ;;  %1466 = vmatprep.subr.bf16.mxu0 %v4606_v27  ;;  %v4681_v26 = vld [vmem:[#allocation4 + $0x544] ss:$16 sps:$4 sm:$0xff]   ;;  %v4684_v27 = vld [vmem:[#allocation4 + $0x54c] ss:$16 sps:$4 sm:$0xff]  }
 0x165   :  { %1426 = vmatpush1.bf16.msra.mxu1 %v4601_v33  ;;  %1467 = vmatpush1.bf16.msra.mxu0 %v4604_v34  ;;  %v4687_v33 = vld [vmem:[#allocation4 + $0x564] ss:$16 sps:$4 sm:$0xff]   ;;  %v4690_v34 = vld [vmem:[#allocation4 + $0x56c] ss:$16 sps:$4 sm:$0xff]  }
 0x166   :  { %1427 = vmatprep.subr.bf16.mxu1 %v4609_v35  ;;  %1468 = vmatprep.subr.bf16.mxu0 %v4612_v17  ;;  %v4685_v35 = vld [vmem:[#allocation4 + $0x560] ss:$16 sps:$4 sm:$0xff]   ;;  %v4688_v17 = vld [vmem:[#allocation4 + $0x568] ss:$16 sps:$4 sm:$0xff]  }
 0x169   :  { %1428 = vmatpush1.bf16.msra.mxu1 %v4607_v40  ;;  %1469 = vmatpush1.bf16.msra.mxu0 %v4610_v41  ;;  %v4699_v40 = vld [vmem:[#allocation4 + $0x5a4] ss:$16 sps:$4 sm:$0xff]   ;;  %v4702_v41 = vld [vmem:[#allocation4 + $0x5ac] ss:$16 sps:$4 sm:$0xff]  }
 0x16a   :  { %1429 = vmatprep.subr.bf16.mxu1 %v4615_v42  ;;  %1470 = vmatprep.subr.bf16.mxu0 %v4618_v43  ;;  %v4697_v42 = vld [vmem:[#allocation4 + $0x5a0] ss:$16 sps:$4 sm:$0xff]   ;;  %v4700_v43 = vld [vmem:[#allocation4 + $0x5a8] ss:$16 sps:$4 sm:$0xff]  }
 0x16d   :  { %1430 = vmatpush1.bf16.msra.mxu1 %v4613_v45  ;;  %1471 = vmatpush1.bf16.msra.mxu0 %v4616_v46  ;;  %v4708_v45 = vld [vmem:[#allocation4 + $0x5cc] ss:$16 sps:$4 sm:$0xff]   ;;  %v4703_v46 = vld [vmem:[#allocation4 + $0x5c0] ss:$16 sps:$4 sm:$0xff]  }
 0x16e   :  { %1905 = vmatprep.subr.bf16.mxu1 %v4621_v47  ;;  %1946 = vmatprep.subr.bf16.mxu0 %v4624_v48  ;;  %v4706_v47 = vld [vmem:[#allocation4 + $0x5c8] ss:$16 sps:$4 sm:$0xff]   ;;  %v4711_v48 = vld [vmem:[#allocation4 + $0x5e4] ss:$16 sps:$4 sm:$0xff]  }
 0x170   :  { %1432 = vmatmul.mubr.bf16.vlgmr.msra.gmra.mrb[8].mxu1 %v5124_v29  ;;  %1473 = vmatmul.mubr.bf16.vlgmr.msra.gmra.mrb[12].mxu0 %v5124_v29  ;;  %v4637_v29 = vld [vmem:[#allocation4 + $0x460] ss:$16 sps:$4 sm:$0xff]  }
 0x171   :  { %1906 = vmatpush1.bf16.msra.mxu1 %v4619_v49  ;;  %1937 = vmatprep.mubr.bf16.mxu1 %v1582_v51  ;;  %v4714_v49 = vld [vmem:[#allocation4 + $0x5ec] ss:$16 sps:$4 sm:$0xff]  }
 0x172   :  { %1947 = vmatpush1.bf16.msra.mxu0 %v4622_v50  ;;  %1978 = vmatprep.mubr.bf16.mxu0 %v1582_v51  ;;  %v4709_v50 = vld [vmem:[#allocation4 + $0x5e0] ss:$16 sps:$4 sm:$0xff]   ;;  %v4712_v51 = vld [vmem:[#allocation4 + $0x5e8] ss:$16 sps:$4 sm:$0xff]  }
 0x173   :  { %1907 = vmatprep.subr.bf16.mxu1 %v4627_v52  ;;  %1948 = vmatprep.subr.bf16.mxu0 %v4630_v53 }
 0x175   :  { %1908 = vmatpush1.bf16.msra.mxu1 %v4625_v54 }
 0x176   :  { %1949 = vmatpush1.bf16.msra.mxu0 %v4628_v19  ;;  %1909 = vmatprep.subr.bf16.mxu1 %v4633_v55 }
 0x177   :  { %1950 = vmatprep.subr.bf16.mxu0 %v4636_v56 }
 0x179   :  { %1910 = vmatpush1.bf16.msra.mxu1 %v4631_v57 }
 0x17a   :  { %1951 = vmatpush1.bf16.msra.mxu0 %v4634_v59  ;;  %1911 = vmatprep.subr.bf16.mxu1 %v4639_v60  ;;  %v4715_v60 = vld [vmem:[%s5638_s5 + $0x40] sm:$0xff]  }
 0x17b   :  { %1952 = vmatprep.subr.bf16.mxu0 %v4642_v61  ;;  %v4717_v61 = vld [vmem:[%s5638_s5 + $0xc0] sm:$0xff]  }
 0x17d   :  { %1912 = vmatpush1.bf16.msra.mxu1 %v4637_v29  ;;  %v4718_v29 = vld [vmem:[%s5638_s5 + $0x80] sm:$0xff]  }
 0x17e   :  { %1953 = vmatpush1.bf16.msra.mxu0 %v4640_v62  ;;  %1913 = vmatprep.subr.bf16.mxu1 %v4645_v63  ;;  %v4719_v62 = vld [vmem:[%s5638_s5 + $0x48] sm:$0xff]  }
 0x17f   :  { %1954 = vmatprep.subr.bf16.mxu0 %v4648_v1  ;;  %v4720_v63 = vld [vmem:[%s5638_s5 + $0x8] sm:$0xff]  }
 0x180   :  { %v4721_v1 = vld [vmem:[%s5638_s5 + $0xc8] sm:$0xff]  }
 0x181   :  { %1914 = vmatpush1.bf16.msra.mxu1 %v4643_v2  ;;  %v4722_v2 = vld [vmem:[%s5638_s5 + $0x88] sm:$0xff]  }
 0x182   :  { %1955 = vmatpush1.bf16.msra.mxu0 %v4646_v3  ;;  %1915 = vmatprep.subr.bf16.mxu1 %v4651_v4  ;;  %v4723_v3 = vld [vmem:[%s5638_s5 + $0x50] sm:$0xff]  }
 0x183   :  { %1956 = vmatprep.subr.bf16.mxu0 %v4654_v5  ;;  %v4724_v4 = vld [vmem:[%s5638_s5 + $0x10] sm:$0xff]  }
 0x184   :  { %v4725_v5 = vld [vmem:[%s5638_s5 + $0xd0] sm:$0xff]  }
 0x185   :  { %1916 = vmatpush1.bf16.msra.mxu1 %v4649_v6  ;;  %v4726_v6 = vld [vmem:[%s5638_s5 + $0x90] sm:$0xff]  }
 0x186   :  { %1957 = vmatpush1.bf16.msra.mxu0 %v4652_v7  ;;  %1917 = vmatprep.subr.bf16.mxu1 %v4657_v8  ;;  %v4727_v7 = vld [vmem:[%s5638_s5 + $0x58] sm:$0xff]  }
 0x187   :  { %1958 = vmatprep.subr.bf16.mxu0 %v4660_v9  ;;  %v4728_v8 = vld [vmem:[%s5638_s5 + $0x18] sm:$0xff]  }
 0x188   :  { %v4729_v9 = vld [vmem:[%s5638_s5 + $0xd8] sm:$0xff]  }
 0x189   :  { %1918 = vmatpush1.bf16.msra.mxu1 %v4655_v11  ;;  %v4730_v11 = vld [vmem:[%s5638_s5 + $0x98] sm:$0xff]  }
 0x18a   :  { %1959 = vmatpush1.bf16.msra.mxu0 %v4658_v12  ;;  %1919 = vmatprep.subr.bf16.mxu1 %v4663_v13  ;;  %v4731_v12 = vld [vmem:[%s5638_s5 + $0x60] sm:$0xff]  }
 0x18b   :  { %1960 = vmatprep.subr.bf16.mxu0 %v4666_v14  ;;  %v4732_v13 = vld [vmem:[%s5638_s5 + $0x20] sm:$0xff]  }
 0x18c   :  { %v4733_v14 = vld [vmem:[%s5638_s5 + $0xe0] sm:$0xff]  }
 0x18d   :  { %1920 = vmatpush1.bf16.msra.mxu1 %v4661_v15  ;;  %v4734_v15 = vld [vmem:[%s5638_s5 + $0xa0] sm:$0xff]  }
 0x18e   :  { %1961 = vmatpush1.bf16.msra.mxu0 %v4664_v16  ;;  %1921 = vmatprep.subr.bf16.mxu1 %v4669_v18  ;;  %v4735_v16 = vld [vmem:[%s5638_s5 + $0x68] sm:$0xff]  }
 0x18f   :  { %1962 = vmatprep.subr.bf16.mxu0 %v4672_v20  ;;  %v4736_v18 = vld [vmem:[%s5638_s5 + $0x28] sm:$0xff]  }
 0x190   :  { %v4737_v20 = vld [vmem:[%s5638_s5 + $0xe8] sm:$0xff]  }
 0x191   :  { %1922 = vmatpush1.bf16.msra.mxu1 %v4667_v21  ;;  %v4738_v21 = vld [vmem:[%s5638_s5 + $0xa8] sm:$0xff]  }
 0x192   :  { %1963 = vmatpush1.bf16.msra.mxu0 %v4670_v22  ;;  %1923 = vmatprep.subr.bf16.mxu1 %v4675_v23  ;;  %v4739_v22 = vld [vmem:[%s5638_s5 + $0x70] sm:$0xff]  }
 0x193   :  { %1964 = vmatprep.subr.bf16.mxu0 %v4678_v24  ;;  %v4741_v23 = vld [vmem:[%s5638_s5 + $0xf0] sm:$0xff]  }
 0x194   :  { %v4740_v24 = vld [vmem:[%s5638_s5 + $0x30] sm:$0xff]  }
 0x195   :  { %1924 = vmatpush1.bf16.msra.mxu1 %v4673_v25  ;;  %v4743_v25 = vld [vmem:[%s5638_s5 + $0x78] sm:$0xff]  }
 0x196   :  { %1965 = vmatpush1.bf16.msra.mxu0 %v4676_v0  ;;  %1925 = vmatprep.subr.bf16.mxu1 %v4681_v26  ;;  %v4742_v0 = vld [vmem:[%s5638_s5 + $0xb0] sm:$0xff]   ;;  %v4745_v26 = vld [vmem:[%s5638_s5 + $0xf8] sm:$0xff]  }
 0x197   :  { %1966 = vmatprep.subr.bf16.mxu0 %v4684_v27  ;;  %v4744_v27 = vld [vmem:[%s5638_s5 + $0x38] sm:$0xff]  }
 0x199   :  { %1926 = vmatpush1.bf16.msra.mxu1 %v4679_v31  ;;  %v4747_v31 = vld [vmem:[%s5638_s5 + $0x140] sm:$0xff]  }
 0x19a   :  { %1967 = vmatpush1.bf16.msra.mxu0 %v4682_v32  ;;  %1927 = vmatprep.subr.bf16.mxu1 %v4687_v33  ;;  %v4746_v32 = vld [vmem:[%s5638_s5 + $0xb8] sm:$0xff]   ;;  %v4750_v33 = vld [vmem:[%s5638_s5 + $0x1c0] sm:$0xff]  }
 0x19b   :  { %1968 = vmatprep.subr.bf16.mxu0 %v4690_v34 }
 0x19d   :  { %1928 = vmatpush1.bf16.msra.mxu1 %v4685_v35 }
 0x19e   :  { %1969 = vmatpush1.bf16.msra.mxu0 %v4688_v17  ;;  %1929 = vmatprep.subr.bf16.mxu1 %v4693_v36 }
 0x19f   :  { %1970 = vmatprep.subr.bf16.mxu0 %v4696_v37 }
 0x1a1   :  { %1930 = vmatpush1.bf16.msra.mxu1 %v4691_v38 }
 0x1a2   :  { %1971 = vmatpush1.bf16.msra.mxu0 %v4694_v39  ;;  %1931 = vmatprep.subr.bf16.mxu1 %v4699_v40 }
 0x1a3   :  { %1972 = vmatprep.subr.bf16.mxu0 %v4702_v41 }
 0x1a5   :  { %1932 = vmatpush1.bf16.msra.mxu1 %v4697_v42 }
 0x1a6   :  { %1973 = vmatpush1.bf16.msra.mxu0 %v4700_v43  ;;  %1933 = vmatprep.subr.bf16.mxu1 %v4705_v44 }
 0x1a7   :  { %1974 = vmatprep.subr.bf16.mxu0 %v4708_v45  ;;  %v1991_v45 = vld [vmem:[%s5637_s4] sm:$0xf] }
 0x1a9   :  { %1934 = vmatpush1.bf16.msra.mxu1 %v4703_v46  ;;  %v2003_v46 = vsub.s32 2, %v4978_v10 }
 0x1aa   :  { %1975 = vmatpush1.bf16.msra.mxu0 %v4706_v47  ;;  %1935 = vmatprep.subr.bf16.mxu1 %v4711_v48  ;;  %v2007_v47 = vsub.s32 3, %v4978_v10  ;;  %v4899_v48 = vmov 1966171168  }
 0x1ab   :  { %1976 = vmatprep.subr.bf16.mxu0 %v4714_v49  ;;  %v2060_v49 = vunpack.c.l.s4 %v4899_v48 }
 0x1ad   :  { %1936 = vmatpush1.bf16.msra.mxu1 %v4709_v50  ;;  %v1996_v50 = vrot.slane %v1991_v45, %v373_v28 }
 0x1ae   :  { %1977 = vmatpush1.bf16.msra.mxu0 %v4712_v51  ;;  %4224 = vmatprep.subr.bf16.mxu1 %v4715_v60 }
 0x1af   :  { %4246 = vmatprep.subr.bf16.mxu0 %v4717_v61  ;;  %v2061_v61 = vunpack.c.0.s8 %v2060_v49 }
 0x1b0   :  { %1938 = vmatmul.mubr.bf16.vlgmr.msra.gmra.mrb[12].mxu1 %v5133_v58 }
 0x1b1   :  { %1979 = vmatmul.mubr.bf16.vlgmr.msra.gmra.mrb[16].mxu0 %v5133_v58  ;;  %v4716_v58 = vld [vmem:[%s5638_s5] sm:$0xff]  }
 0x1b2   :  { %4225 = vmatpush3.bf16.msra.mxu1 %v4716_v58  ;;  %4247 = vmatpush3.bf16.msra.mxu0 %v4718_v29 }
 0x1b3   :  { %4226 = vmatprep.subr.bf16.mxu1 %v4719_v62  ;;  %4248 = vmatprep.subr.bf16.mxu0 %v4721_v1 }
 0x1b6   :  { %4227 = vmatpush3.bf16.msra.mxu1 %v4720_v63  ;;  %4249 = vmatpush3.bf16.msra.mxu0 %v4722_v2 }
 0x1b7   :  { %4228 = vmatprep.subr.bf16.mxu1 %v4723_v3  ;;  %4250 = vmatprep.subr.bf16.mxu0 %v4725_v5 }
 0x1ba   :  { %4229 = vmatpush3.bf16.msra.mxu1 %v4724_v4  ;;  %4251 = vmatpush3.bf16.msra.mxu0 %v4726_v6  ;;  %v4900_v6 = vmov 1935823168  }
 0x1bb   :  { %4230 = vmatprep.subr.bf16.mxu1 %v4727_v7  ;;  %4252 = vmatprep.subr.bf16.mxu0 %v4729_v9  ;;  %v5265_v9 = vsub.s32 %v2061_v61, %v4978_v10 }
 0x1be   :  { %4231 = vmatpush3.bf16.msra.mxu1 %v4728_v8  ;;  %4253 = vmatpush3.bf16.msra.mxu0 %v4730_v11 }
 0x1bf   :  { %4232 = vmatprep.subr.bf16.mxu1 %v4731_v12  ;;  %4254 = vmatprep.subr.bf16.mxu0 %v4733_v14 }
 0x1c2   :  { %4233 = vmatpush3.bf16.msra.mxu1 %v4732_v13  ;;  %4255 = vmatpush3.bf16.msra.mxu0 %v4734_v15 }
 0x1c3   :  { %4234 = vmatprep.subr.bf16.mxu1 %v4735_v16  ;;  %4256 = vmatprep.subr.bf16.mxu0 %v4737_v20 }
 0x1c6   :  { %4235 = vmatpush3.bf16.msra.mxu1 %v4736_v18  ;;  %4257 = vmatpush3.bf16.msra.mxu0 %v4738_v21 }
 0x1c7   :  { %4236 = vmatprep.subr.bf16.mxu1 %v4739_v22  ;;  %4258 = vmatprep.subr.bf16.mxu0 %v4741_v23 }
 0x1ca   :  { %4237 = vmatpush3.bf16.msra.mxu1 %v4740_v24  ;;  %4259 = vmatpush3.bf16.msra.mxu0 %v4742_v0 }
 0x1cb   :  { %4238 = vmatprep.subr.bf16.mxu1 %v4743_v25  ;;  %4260 = vmatprep.subr.bf16.mxu0 %v4745_v26 }
 0x1ce   :  { %4239 = vmatpush3.bf16.msra.mxu1 %v4744_v27  ;;  %4261 = vmatpush3.bf16.msra.mxu0 %v4746_v32 }
 0x1cf   :  { %4268 = vmatprep.subr.bf16.mxu1 %v4747_v31  ;;  %4290 = vmatprep.subr.bf16.mxu0 %v4750_v33 }
 0x203   :  { %v5141_v52 = vpop.f32.mrb[4].mxu1  ;;  %v5143_v53 = vpop.f32.mrb[8].mxu0 }
 0x204   :  { %v5145_v54 = vpop.f32.mrb[5].mxu1  ;;  %v5147_v19 = vpop.f32.mrb[9].mxu0 }
 0x205   :  { %v1024_v55 = vpop.f32.mrb[6].mxu1  ;;  %v1065_v56 = vpop.f32.mrb[10].mxu0 }
 0x206   :  { %v1025_v57 = vpop.f32.mrb[7].mxu1  ;;  %v1066_v59 = vpop.f32.mrb[11].mxu0  ;;  %v2008_v56 = vrot.slane %v1991_v45, %v2007_v47 }
 0x243   :  { %v1433_v34 = vpop.f32.mrb[8].mxu1  ;;  %v1474_v35 = vpop.f32.mrb[12].mxu0 }
 0x244   :  { %v1434_v17 = vadd.f32 %v1433_v34, %v5141_v52  ;;  %v1475_v36 = vadd.f32 %v1474_v35, %v5143_v53  ;;  %v1435_v37 = vpop.f32.mrb[9].mxu1  ;;  %v1476_v38 = vpop.f32.mrb[13].mxu0  ;;  %v2004_v52 = vrot.slane %v1991_v45, %v2003_v46  ;;  %v2000_v53 = vrot.slane %v1991_v45, %v377_v30 }
 0x245   :  { %v1436_v39 = vadd.f32 %v1435_v37, %v5145_v54  ;;  %v1477_v40 = vadd.f32 %v1476_v38, %v5147_v19  ;;  %v1437_v41 = vpop.f32.mrb[10].mxu1  ;;  %v1478_v42 = vpop.f32.mrb[14].mxu0  ;;  %v2106_v30 = vunpack.c.l.s4 %v4900_v6 }
 0x246   :  { %v1438_v43 = vpop.f32.mrb[11].mxu1  ;;  %v1479_v44 = vpop.f32.mrb[15].mxu0 }
 0x247   :  { %v2107_v22 = vunpack.c.0.s8 %v2106_v30 }
 0x249   :  { %v2110_v33 = vsub.s32 %v2107_v22, %v4978_v10 }
 0x283   :  { %v1939_v51 = vpop.f32.mrb[12].mxu1 }
 0x284   :  { %v1987_v54 = vadd.f32 %v1939_v51, %v1434_v17  ;;  %v1980_v19 = vpop.f32.mrb[16].mxu0  ;;  %v1941_v55 = vpop.f32.mrb[13].mxu1 }
 0x285   :  { %v1989_v57 = vadd.f32 %v1980_v19, %v1475_v36  ;;  %v1988_v59 = vadd.f32 %v1941_v55, %v1436_v39  ;;  %v1982_v60 = vpop.f32.mrb[17].mxu0  ;;  %v1943_v58 = vpop.f32.mrb[14].mxu1 }
 0x286   :  { %v2013_v29 = vadd.f32 %v1996_v50, %v1987_v54  ;;  %v1990_v62 = vadd.f32 %v1982_v60, %v1477_v40  ;;  %v1984_v63 = vpop.f32.mrb[18].mxu0  ;;  %v1944_v1 = vpop.f32.mrb[15].mxu1 }
 0x287   :  { %v2015_v2 = vadd.f32 %v2004_v52, %v1989_v57  ;;  %v2014_v28 = vadd.f32 %v2000_v53, %v1988_v59  ;;  %v1985_v3 = vpop.f32.mrb[19].mxu0 }
 0x288   :  { %v2017_v4 = vmax.f32 %v2013_v29, 0.0  ;;  %v2016_v5 = vadd.f32 %v2008_v56, %v1990_v62 }
 0x289   :  { %v2019_v7 = vmax.f32 %v2015_v2, 0.0  ;;  %v2018_v8 = vmax.f32 %v2014_v28, 0.0 }
 0x28a   :  { %v2020_v11 = vmax.f32 %v2016_v5, 0.0 }
 0x28b   :  { %v2025_v12 = vcombine.low %v2017_v4, %v2018_v8  ;;  %v2026_v13 = vcombine.high %v2017_v4, %v2018_v8  ;;  %v4081_v14 = vcombine.low %v2018_v8, %v2018_v8  ;;  %v4083_v15 = vcombine.high %v2018_v8, %v2018_v8 }
 0x28c   :  { %v2027_v16 = vcombine.low %v2019_v7, %v2020_v11  ;;  %v2028_v18 = vcombine.high %v2019_v7, %v2020_v11  ;;  %v4082_v20 = vcombine.low %v2020_v11, %v2020_v11  ;;  %v4084_v21 = vcombine.high %v2020_v11, %v2020_v11 }
 0x28d   :  { %v4085_v23 = vpack.c.bf16 %v4081_v14, %v2025_v12  ;;  %v4087_v24 = vpack.c.bf16 %v4083_v15, %v2026_v13 }
 0x28e   :  { %v4086_v25 = vpack.c.bf16 %v4082_v20, %v2027_v16  ;;  %v4088_v0 = vpack.c.bf16 %v4084_v21, %v2028_v18 }
 0x28f   :  { %v2065_v26 = vrot.slane %v4085_v23, %v5265_v9  ;;  %v2089_v27 = vrot.slane %v4087_v24, %v5265_v9 }
 0x290   :  { %v2072_v31 = vrot.slane %v4086_v25, %v5265_v9  ;;  %v2096_v32 = vrot.slane %v4088_v0, %v5265_v9 }
 0x292   :  { %v2073_v34 = vcombine.low %v2065_v26, %v2072_v31  ;;  %v2097_v35 = vcombine.low %v2089_v27, %v2096_v32  ;;  %v2226_v17 = vcombine.high %v2065_v26, %v2072_v31  ;;  %v2234_v36 = vcombine.high %v2089_v27, %v2096_v32 }
 0x294   :  { %v2080_v37 = vrot.slane %v2073_v34, %v5265_v9  ;;  %v2104_v38 = vrot.slane %v2097_v35, %v5265_v9  ;;  %v2233_v39 = vrot.slane %v2226_v17, %v5265_v9  ;;  %v2241_v40 = vrot.slane %v2234_v36, %v5265_v9 }
 0x296   :  { %v2111_v41 = vrot.slane %v2080_v37, %v2110_v33  ;;  %v2133_v42 = vrot.slane %v2104_v38, %v2110_v33  ;;  %v2248_v43 = vrot.slane %v2233_v39, %v2110_v33  ;;  %v2270_v44 = vrot.slane %v2241_v40, %v2110_v33 }
 0x298   :  { %v2112_v45 = vcombine.high %v2111_v41, %v2111_v41  ;;  %v2119_v46 = vrot.slane %v2111_v41, %v2110_v33  ;;  %v2134_v10 = vcombine.high %v2133_v42, %v2133_v42  ;;  %v2141_v47 = vrot.slane %v2133_v42, %v2110_v33 }
 0x299   :  { %v2249_v48 = vcombine.high %v2248_v43, %v2248_v43  ;;  %v5276_v49 = vrot.slane %v2248_v43, %v2110_v33  ;;  %v2271_v50 = vcombine.high %v2270_v44, %v2270_v44  ;;  %v2278_v51 = vrot.slane %v2270_v44, %v2110_v33 }
 0x29a   :  { %v2126_v52 = vrot.slane %v2112_v45, %v2110_v33  ;;  %v2148_v53 = vrot.slane %v2134_v10, %v2110_v33  ;;  %v2149_v54 = vunpack.c.l.b16 %v2119_v46  ;;  %v2150_v19 = vunpack.c.h.b16 %v2119_v46 }
 0x29b   :  { %v2153_v55 = vunpack.c.l.b16 %v2141_v47  ;;  %v2154_v56 = vunpack.c.h.b16 %v2141_v47  ;;  %v2263_v57 = vrot.slane %v2249_v48, %v2110_v33  ;;  %v2285_v59 = vrot.slane %v2271_v50, %v2110_v33 }
 0x29c   :  { %v2151_v60 = vunpack.c.l.b16 %v2126_v52  ;;  %v2152_v58 = vunpack.c.h.b16 %v2126_v52  ;;  %v2155_v61 = vunpack.c.l.b16 %v2148_v53  ;;  %v2156_v29 = vunpack.c.h.b16 %v2148_v53 }
 0x29d   :  { %v2157_v62 = vrot.slane %v2153_v55, 7  ;;  %v2160_v63 = vrot.slane %v2154_v56, 7  ;;  %v2192_v1 = vrot.slane %v2149_v54, 1  ;;  %v2194_v2 = vrot.slane %v2150_v19, 1 }
 0x29e   :  { %v2162_v28 = vrot.slane %v2155_v61, 7  ;;  %v2164_v3 = vrot.slane %v2156_v29, 7  ;;  %v2196_v4 = vrot.slane %v2151_v60, 1  ;;  %v2198_v5 = vrot.slane %v2152_v58, 1 }
 0x29f   :  { %v2159_v6 = vsel %vm2158_vm14, %v2157_v62, %v2149_v54  ;;  %v2161_v30 = vsel %vm2158_vm14, %v2160_v63, %v2150_v19  ;;  %v2193_v7 = vsel %vm2158_vm14, %v2153_v55, %v2192_v1  ;;  %v2195_v8 = vsel %vm2158_vm14, %v2154_v56, %v2194_v2 }
 0x2a0   :  { %v2163_v11 = vsel %vm2158_vm14, %v2162_v28, %v2151_v60  ;;  %v2165_v12 = vsel %vm2158_vm14, %v2164_v3, %v2152_v58  ;;  %v2166_v13 = vpack.c.b16 %v2161_v30, %v2159_v6  ;;  %v2197_v14 = vsel %vm2158_vm14, %v2155_v61, %v2196_v4  ;;  %v4748_v28 = vld [vmem:[%s5638_s5 + $0x100] sm:$0xff]   ;;  %v4752_v30 = vld [vmem:[%s5638_s5 + $0x148] sm:$0xff]  }
 0x2a1   :  { %v2167_v15 = vpack.c.b16 %v2165_v12, %v2163_v11  ;;  %v2199_v16 = vsel %vm2158_vm14, %v2156_v29, %v2198_v5  ;;  %v2200_v18 = vpack.c.b16 %v2195_v8, %v2193_v7  ;;  %v2286_v20 = vunpack.c.l.b16 %v5276_v49  ;;  %v4751_v6 = vld [vmem:[%s5638_s5 + $0x180] sm:$0xff]   ;;  %v4754_v8 = vld [vmem:[%s5638_s5 + $0x1c8] sm:$0xff]  }
 0x2a2   :  { %v2174_v21 = vrot.slane %v2166_v13, %v5265_v9  ;;  %v2201_v22 = vpack.c.b16 %v2199_v16, %v2197_v14  ;;  %v2287_v23 = vunpack.c.h.b16 %v5276_v49  ;;  %v2288_v24 = vunpack.c.l.b16 %v2263_v57  ;;  %v4753_v12 = vld [vmem:[%s5638_s5 + $0x108] sm:$0xff]   ;;  %v4756_v13 = vld [vmem:[%s5638_s5 + $0x150] sm:$0xff]  }
 0x2a3   :  { %v2181_v25 = vrot.slane %v2167_v15, %v5265_v9  ;;  %v2208_v0 = vrot.slane %v2200_v18, %v5265_v9  ;;  %v2289_v26 = vunpack.c.h.b16 %v2263_v57  ;;  %v2290_v27 = vunpack.c.l.b16 %v2278_v51  ;;  %v4755_v14 = vld [vmem:[%s5638_s5 + $0x188] sm:$0xff]   ;;  %v4758_v15 = vld [vmem:[%s5638_s5 + $0x1d0] sm:$0xff]   ;;  %v4760_v18 = vld [vmem:[%s5638_s5 + $0x158] sm:$0xff]  }
 0x2a4   :  { %v2215_v31 = vrot.slane %v2201_v22, %v5265_v9  ;;  %v2291_v32 = vunpack.c.h.b16 %v2278_v51  ;;  %v2292_v33 = vunpack.c.l.b16 %v2285_v59  ;;  %v2293_v34 = vunpack.c.h.b16 %v2285_v59  ;;  %v4757_v16 = vld [vmem:[%s5638_s5 + $0x110] sm:$0xff]   ;;  %v4761_v22 = vld [vmem:[%s5638_s5 + $0x118] sm:$0xff]  }
 0x2a5   :  { %v2182_v35 = vcombine.low %v2174_v21, %v2181_v25  ;;  %v2294_v17 = vrot.slane %v2290_v27, 7  ;;  %v2328_v36 = vrot.slane %v2286_v20, 1  ;;  %v2330_v37 = vrot.slane %v2287_v23, 1  ;;  %v4762_v21 = vld [vmem:[%s5638_s5 + $0x1d8] sm:$0xff]   ;;  %v4766_v25 = vld [vmem:[%s5638_s5 + $0x1e0] sm:$0xff]  }
 0x2a6   :  { %v2216_v38 = vcombine.low %v2208_v0, %v2215_v31  ;;  %v2296_v39 = vrot.slane %v2291_v32, 7  ;;  %v2298_v40 = vrot.slane %v2292_v33, 7  ;;  %v2300_v41 = vrot.slane %v2293_v34, 7  ;;  %v4765_v0 = vld [vmem:[%s5638_s5 + $0x120] sm:$0xff]   ;;  %v4770_v31 = vld [vmem:[%s5638_s5 + $0x1e8] sm:$0xff]  }
 0x2a7   :  { %4089 = vst.sshfl [vmem:[#allocation3] sm:$0x55 pattern:$0x73625140] %v2182_v35  ;;  %v2295_v42 = vsel %vm2158_vm14, %v2294_v17, %v2286_v20  ;;  %v2329_v43 = vsel %vm2158_vm14, %v2290_v27, %v2328_v36  ;;  %v2331_v44 = vsel %vm2158_vm14, %v2291_v32, %v2330_v37  ;;  %v2332_v45 = vrot.slane %v2288_v24, 1  ;;  %v4759_v20 = vld [vmem:[%s5638_s5 + $0x190] sm:$0xff]  }
 0x2a8   :  { %4090 = vst.sshfl [vmem:[#allocation3 + $0x4] sm:$0x55 pattern:$0x73625140] %v2216_v38  ;;  %v2297_v46 = vsel %vm2158_vm14, %v2296_v39, %v2287_v23  ;;  %v2299_v10 = vsel %vm2158_vm14, %v2298_v40, %v2288_v24  ;;  %v2301_v47 = vsel %vm2158_vm14, %v2300_v41, %v2289_v26  ;;  %v2334_v48 = vrot.slane %v2289_v26, 1  ;;  %v4764_v23 = vld [vmem:[%s5638_s5 + $0x160] sm:$0xff]  }
 0x2a9   :  { %v2302_v49 = vpack.c.b16 %v2297_v46, %v2295_v42  ;;  %v2303_v50 = vpack.c.b16 %v2301_v47, %v2299_v10  ;;  %v2333_v51 = vsel %vm2158_vm14, %v2292_v33, %v2332_v45  ;;  %v2336_v52 = vpack.c.b16 %v2331_v44, %v2329_v43  ;;  %v4763_v24 = vld [vmem:[%s5638_s5 + $0x198] sm:$0xff]   ;;  %v4768_v26 = vld [vmem:[%s5638_s5 + $0x168] sm:$0xff]   ;;  %v4767_v27 = vld [vmem:[%s5638_s5 + $0x1a0] sm:$0xff]  }
 0x2aa   :  { %v2335_v53 = vsel %vm2158_vm14, %v2293_v34, %v2334_v48  ;;  %v4769_v32 = vld [vmem:[%s5638_s5 + $0x128] sm:$0xff]   ;;  %v4772_v33 = vld [vmem:[%s5638_s5 + $0x170] sm:$0xff]   ;;  %v4776_v38 = vld [vmem:[%s5638_s5 + $0x178] sm:$0xff]  }
 0x2ab   :  { %v2310_v54 = vrot.slane %v2302_v49, %v5265_v9  ;;  %v2317_v19 = vrot.slane %v2303_v50, %v5265_v9  ;;  %v2337_v55 = vpack.c.b16 %v2335_v53, %v2333_v51  ;;  %v2344_v57 = vrot.slane %v2336_v52, %v5265_v9  ;;  %v4771_v35 = vld [vmem:[%s5638_s5 + $0x1a8] sm:$0xff]   ;;  %v4774_v17 = vld [vmem:[%s5638_s5 + $0x1f0] sm:$0xff]   ;;  %v4778_v40 = vld [vmem:[%s5638_s5 + $0x1f8] sm:$0xff]  }
 0x2ac   :  { %v4773_v36 = vld [vmem:[%s5638_s5 + $0x130] sm:$0xff]   ;;  %v4777_v41 = vld [vmem:[%s5638_s5 + $0x138] sm:$0xff]   ;;  %v4780_v43 = vld [vmem:[%s5638_s5 + $0x240] sm:$0xff]  }
 0x2ad   :  { %v2318_v56 = vcombine.low %v2310_v54, %v2317_v19  ;;  %v2351_v59 = vrot.slane %v2337_v55, %v5265_v9  ;;  %v4775_v39 = vld [vmem:[%s5638_s5 + $0x1b0] sm:$0xff]   ;;  %v4779_v44 = vld [vmem:[%s5638_s5 + $0x1b8] sm:$0xff]   ;;  %v4782_v46 = vld [vmem:[%s5638_s5 + $0x2c0] sm:$0xff]  }
 0x2ae   :  { %v4781_v10 = vld [vmem:[%s5638_s5 + $0x200] sm:$0xff]   ;;  %v4784_v48 = vld [vmem:[%s5638_s5 + $0x248] sm:$0xff]   ;;  %v4788_v54 = vld [vmem:[%s5638_s5 + $0x250] sm:$0xff]  }
 0x2af   :  { %4091 = vst.sshfl [vmem:[#allocation3 + $0x8] sm:$0x55 pattern:$0x73625140] %v2318_v56  ;;  %v2352_v60 = vcombine.low %v2344_v57, %v2351_v59  ;;  %v2362_v58 = vld [vmem:[#allocation3] sm:$0xff]  ;;  %v4783_v49 = vld [vmem:[%s5638_s5 + $0x280] sm:$0xff]  }
 0x2b0   :  { %v2636_v61 = vrot.slane %v2362_v58, %v5265_v9  ;;  %v2629_v29 = vcombine.high %v2362_v58, %v2362_v58  ;;  %v4786_v51 = vld [vmem:[%s5638_s5 + $0x2c8] sm:$0xff]   ;;  %v4790_v55 = vld [vmem:[%s5638_s5 + $0x2d0] sm:$0xff]   ;;  %v4792_v57 = vld [vmem:[%s5638_s5 + $0x258] sm:$0xff]  }
 0x2b1   :  { %4092 = vst.sshfl [vmem:[#allocation3 + $0xc] sm:$0x55 pattern:$0x73625140] %v2352_v60  ;;  %v4785_v53 = vld [vmem:[%s5638_s5 + $0x208] sm:$0xff]   ;;  %v4789_v56 = vld [vmem:[%s5638_s5 + $0x210] sm:$0xff]  }
 0x2b2   :  { %v2644_v62 = vcombine.high %v2636_v61, %v2636_v61  ;;  %v5306_v63 = vrot.slane %v2629_v29, %v5265_v9  ;;  %v2652_v1 = vrot.slane %v2636_v61, %v5265_v9  ;;  %v4787_v19 = vld [vmem:[%s5638_s5 + $0x288] sm:$0xff]   ;;  %v4791_v59 = vld [vmem:[%s5638_s5 + $0x290] sm:$0xff]   ;;  %v4794_v60 = vld [vmem:[%s5638_s5 + $0x2d8] sm:$0xff]  }
 0x2b3   :  { %v4793_v58 = vld [vmem:[%s5638_s5 + $0x218] sm:$0xff]   ;;  %v4796_v61 = vld [vmem:[%s5638_s5 + $0x260] sm:$0xff]  }
 0x2b4   :  { %v2666_v2 = vrot.slane %v2644_v62, %v5265_v9  ;;  %v2645_v3 = vcombine.high %v5306_v63, %v5306_v63  ;;  %v2674_v7 = vcombine.high %v2652_v1, %v2652_v1  ;;  %v2659_v45 = vrot.slane %v5306_v63, %v5265_v9  ;;  %v4795_v29 = vld [vmem:[%s5638_s5 + $0x298] sm:$0xff]   ;;  %v4798_v62 = vld [vmem:[%s5638_s5 + $0x2e0] sm:$0xff]  }
 0x2b5   :  { %v4797_v63 = vld [vmem:[%s5638_s5 + $0x220] sm:$0xff]  }
 0x2b6   :  { %3543 = vmatprep.mubr.bf16.mxu1 %v2666_v2  ;;  %v2676_v4 = vcombine.high %v2666_v2, %v2666_v2  ;;  %v2673_v5 = vrot.slane %v2645_v3, %v5265_v9  ;;  %v2675_v50 = vcombine.high %v2659_v45, %v2659_v45  ;;  %v4799_v2 = vld [vmem:[%s5638_s5 + $0x2a0] sm:$0xff]   ;;  %v4801_v3 = vld [vmem:[%s5638_s5 + $0x228] sm:$0xff]  }
 0x2b7   :  { %3544 = vmatmul.mubr.bf16.vlgmr.msra.gmra.mrb[16].mxu1 %v2652_v1  ;;  %v4800_v1 = vld [vmem:[%s5638_s5 + $0x268] sm:$0xff]  }
 0x2b8   :  { %4269 = vmatpush3.bf16.msra.mxu1 %v4748_v28  ;;  %3583 = vmatprep.mubr.bf16.mxu0 %v2676_v4  ;;  %v2677_v11 = vcombine.high %v2673_v5, %v2673_v5  ;;  %v5379_v34 = vld [vmem:[#allocation3 + $0x8] sm:$0xff]  ;;  %v4802_v28 = vld [vmem:[%s5638_s5 + $0x2e8] sm:$0xff]  }
 0x2b9   :  { %3623 = vmatprep.mubr.bf16.mxu1 %v2673_v5  ;;  %3584 = vmatmul.mubr.bf16.vlgmr.msra.gmra.mrb[20].mxu0 %v2674_v7  ;;  %v5392_v37 = vrot.slane %v5379_v34, %v5265_v9  ;;  %v2678_v4 = vcombine.high %v5379_v34, %v5379_v34  ;;  %v4804_v5 = vld [vmem:[%s5638_s5 + $0x270] sm:$0xff]  }
 0x2ba   :  { %4291 = vmatpush3.bf16.msra.mxu0 %v4751_v6  ;;  %4270 = vmatprep.subr.bf16.mxu1 %v4752_v30  ;;  %v4803_v6 = vld [vmem:[%s5638_s5 + $0x2a8] sm:$0xff]   ;;  %v4806_v30 = vld [vmem:[%s5638_s5 + $0x2f0] sm:$0xff]  }
 0x2bb   :  { %3663 = vmatprep.mubr.bf16.mxu0 %v2677_v11  ;;  %4292 = vmatprep.subr.bf16.mxu0 %v4754_v8  ;;  %v2693_v42 = vcombine.high %v5392_v37, %v5392_v37  ;;  %v4805_v7 = vld [vmem:[%s5638_s5 + $0x230] sm:$0xff]   ;;  %v5498_v8 = vrot.slane %v2678_v4, %v5265_v9  ;;  %v4808_v11 = vld [vmem:[%s5638_s5 + $0x278] sm:$0xff]  }
 0x2bc   :  { %4271 = vmatpush3.bf16.msra.mxu1 %v4753_v12  ;;  %v4807_v12 = vld [vmem:[%s5638_s5 + $0x2b0] sm:$0xff]  }
 0x2bd   :  { %4272 = vmatprep.subr.bf16.mxu1 %v4756_v13  ;;  %v2715_v47 = vrot.slane %v2693_v42, %v5265_v9  ;;  %v4810_v13 = vld [vmem:[%s5638_s5 + $0x2f8] sm:$0xff]   ;;  %v4823_v34 = vld [vmem:[%s5638_s5 + $0x3d0] sm:$0xff]   ;;  %v4830_v42 = vld [vmem:[%s5638_s5 + $0x320] sm:$0xff]  }
 0x2be   :  { %4293 = vmatpush3.bf16.msra.mxu0 %v4755_v14  ;;  %v4809_v14 = vld [vmem:[%s5638_s5 + $0x238] sm:$0xff]  }
 0x2bf   :  { %4294 = vmatprep.subr.bf16.mxu0 %v4758_v15  ;;  %v2725_v52 = vcombine.high %v2715_v47, %v2715_v47  ;;  %v2694_v15 = vcombine.high %v5498_v8, %v5498_v8 }
 0x2c0   :  { %4273 = vmatpush3.bf16.msra.mxu1 %v4757_v16  ;;  %v4812_v16 = vld [vmem:[%s5638_s5 + $0x340] sm:$0xff]  }
 0x2c1   :  { %4274 = vmatprep.subr.bf16.mxu1 %v4760_v18  ;;  %v4811_v18 = vld [vmem:[%s5638_s5 + $0x2b8] sm:$0xff]  }
 0x2c2   :  { %4295 = vmatpush3.bf16.msra.mxu0 %v4759_v20  ;;  %v2701_v20 = vrot.slane %v5392_v37, %v5265_v9  ;;  %v4827_v37 = vld [vmem:[%s5638_s5 + $0x3d8] sm:$0xff]  }
 0x2c3   :  { %4296 = vmatprep.subr.bf16.mxu0 %v4762_v21  ;;  %v4815_v21 = vld [vmem:[%s5638_s5 + $0x3c0] sm:$0xff]  }
 0x2c4   :  { %4275 = vmatpush3.bf16.msra.mxu1 %v4761_v22  ;;  %v4813_v22 = vld [vmem:[%s5638_s5 + $0x300] sm:$0xff]  }
 0x2c5   :  { %4276 = vmatprep.subr.bf16.mxu1 %v4764_v23  ;;  %v2722_v23 = vrot.slane %v2694_v15, %v5265_v9 }
 0x2c6   :  { %4297 = vmatpush3.bf16.msra.mxu0 %v4763_v24  ;;  %v4817_v24 = vld [vmem:[%s5638_s5 + $0x348] sm:$0xff]  }
 0x2c7   :  { %4298 = vmatprep.subr.bf16.mxu0 %v4766_v25  ;;  %v4816_v25 = vld [vmem:[%s5638_s5 + $0x380] sm:$0xff]  }
 0x2c8   :  { %4277 = vmatpush3.bf16.msra.mxu1 %v4765_v0  ;;  %v2723_v0 = vcombine.high %v2701_v20, %v2701_v20 }
 0x2c9   :  { %4278 = vmatprep.subr.bf16.mxu1 %v4768_v26  ;;  %v4819_v26 = vld [vmem:[%s5638_s5 + $0x3c8] sm:$0xff]  }
 0x2ca   :  { %4299 = vmatpush3.bf16.msra.mxu0 %v4767_v27  ;;  %v2726_v27 = vcombine.high %v2722_v23, %v2722_v23 }
 0x2cb   :  { %4300 = vmatprep.subr.bf16.mxu0 %v4770_v31  ;;  %v4818_v31 = vld [vmem:[%s5638_s5 + $0x308] sm:$0xff]  }
 0x2cc   :  { %4279 = vmatpush3.bf16.msra.mxu1 %v4769_v32  ;;  %v4821_v32 = vld [vmem:[%s5638_s5 + $0x350] sm:$0xff]  }
 0x2cd   :  { %4280 = vmatprep.subr.bf16.mxu1 %v4772_v33  ;;  %v4820_v33 = vld [vmem:[%s5638_s5 + $0x388] sm:$0xff]  }
 0x2ce   :  { %4301 = vmatpush3.bf16.msra.mxu0 %v4771_v35  ;;  %v4822_v35 = vld [vmem:[%s5638_s5 + $0x310] sm:$0xff]  }
 0x2cf   :  { %4302 = vmatprep.subr.bf16.mxu0 %v4774_v17  ;;  %v4825_v17 = vld [vmem:[%s5638_s5 + $0x358] sm:$0xff]  }
 0x2d0   :  { %4281 = vmatpush3.bf16.msra.mxu1 %v4773_v36  ;;  %v4824_v36 = vld [vmem:[%s5638_s5 + $0x390] sm:$0xff]  }
 0x2d1   :  { %4282 = vmatprep.subr.bf16.mxu1 %v4776_v38  ;;  %v4826_v38 = vld [vmem:[%s5638_s5 + $0x318] sm:$0xff]  }
 0x2d2   :  { %4303 = vmatpush3.bf16.msra.mxu0 %v4775_v39  ;;  %v4829_v39 = vld [vmem:[%s5638_s5 + $0x360] sm:$0xff]  }
 0x2d3   :  { %4304 = vmatprep.subr.bf16.mxu0 %v4778_v40  ;;  %v4828_v40 = vld [vmem:[%s5638_s5 + $0x398] sm:$0xff]  }
 0x2d4   :  { %4283 = vmatpush3.bf16.msra.mxu1 %v4777_v41  ;;  %v4831_v41 = vld [vmem:[%s5638_s5 + $0x3e0] sm:$0xff]  }
 0x2d5   :  { %4312 = vmatprep.subr.bf16.mxu1 %v4780_v43  ;;  %v4833_v43 = vld [vmem:[%s5638_s5 + $0x368] sm:$0xff]  }
 0x2d6   :  { %4305 = vmatpush3.bf16.msra.mxu0 %v4779_v44  ;;  %v4832_v44 = vld [vmem:[%s5638_s5 + $0x3a0] sm:$0xff]  }
 0x2d7   :  { %3624 = vmatmul.mubr.bf16.vlgmr.msra.gmra.mrb[20].mxu1 %v2659_v45  ;;  %4334 = vmatprep.subr.bf16.mxu0 %v4782_v46  ;;  %v4835_v45 = vld [vmem:[%s5638_s5 + $0x3e8] sm:$0xff]  }
 0x2d8   :  { %4313 = vmatpush3.bf16.msra.mxu1 %v4781_v10  ;;  %3703 = vmatprep.mubr.bf16.mxu1 %v2715_v47  ;;  %v4834_v46 = vld [vmem:[%s5638_s5 + $0x328] sm:$0xff]   ;;  %v4837_v10 = vld [vmem:[%s5638_s5 + $0x370] sm:$0xff]  }
 0x2d9   :  { %3664 = vmatmul.mubr.bf16.vlgmr.msra.gmra.mrb[24].mxu0 %v2675_v50  ;;  %4314 = vmatprep.subr.bf16.mxu1 %v4784_v48  ;;  %v4836_v47 = vld [vmem:[%s5638_s5 + $0x3a8] sm:$0xff]   ;;  %v4839_v48 = vld [vmem:[%s5638_s5 + $0x3f0] sm:$0xff]   ;;  %v4841_v50 = vld [vmem:[%s5638_s5 + $0x378] sm:$0xff]  }
 0x2da   :  { %4335 = vmatpush3.bf16.msra.mxu0 %v4783_v49  ;;  %3743 = vmatprep.mubr.bf16.mxu0 %v2725_v52  ;;  %v4838_v49 = vld [vmem:[%s5638_s5 + $0x330] sm:$0xff]   ;;  %v4843_v52 = vld [vmem:[%s5638_s5 + $0x3f8] sm:$0xff]  }
 0x2db   :  { %4336 = vmatprep.subr.bf16.mxu0 %v4786_v51  ;;  %v4840_v51 = vld [vmem:[%s5638_s5 + $0x3b0] sm:$0xff]  }
 0x2dc   :  { %4315 = vmatpush3.bf16.msra.mxu1 %v4785_v53  ;;  %v4842_v53 = vld [vmem:[%s5638_s5 + $0x338] sm:$0xff]  }
 0x2dd   :  { %4316 = vmatprep.subr.bf16.mxu1 %v4788_v54  ;;  %v4844_v54 = vld [vmem:[%s5638_s5 + $0x3b8] sm:$0xff]   ;;  %s4901_s5 = smov [#allocation7]  }
 0x2de   :  { %4337 = vmatpush3.bf16.msra.mxu0 %v4787_v19  ;;  %v2708_v19 = vrot.slane %v5498_v8, %v5265_v9 }
 0x2df   :  { %4338 = vmatprep.subr.bf16.mxu0 %v4790_v55 }
 0x2e0   :  { %4317 = vmatpush3.bf16.msra.mxu1 %v4789_v56  ;;  %v2724_v55 = vcombine.high %v2708_v19, %v2708_v19 }
 0x2e1   :  { %4318 = vmatprep.subr.bf16.mxu1 %v4792_v57  ;;  %v4093_v57 = vld [vmem:[%s5639_s6] ss:$0 sm:$0xff]  ;;  %s3839_s6 = sshll.u32 %s4901_s5, 4  ;;  %s3840_s6 = int_to_ptr.vmem [resolvable:$true] %s3839_s6 }
 0x2e2   :  { %4339 = vmatpush3.bf16.msra.mxu0 %v4791_v59  ;;  %s4868_s10 = scalar_lea.vmem %s3840_s6, 32  ;;  %p4873_p9 = scmp.lt.s32.totalorder %s3840_s6, %s3840_s6 }
 0x2e3   :  { %4340 = vmatprep.subr.bf16.mxu0 %v4794_v60  ;;  %p4869_p8 = scmp.ne.s32.totalorder %s3840_s6, %s4868_s10  ;;  %p4874_p10 = scmp.lt.s32.totalorder %s4868_s10, %s4868_s10 }
 0x2e4   :  { %4319 = vmatpush3.bf16.msra.mxu1 %v4793_v58 }
 0x2e5   :  { %4320 = vmatprep.subr.bf16.mxu1 %v4796_v61  ;;  %p4875_p11 = por %p4874_p10, %p4873_p9 }
 0x2e6   :  { %4341 = vmatpush3.bf16.msra.mxu0 %v4795_v29 }
 0x2e7   :  { %4342 = vmatprep.subr.bf16.mxu0 %v4798_v62  ;;  %p4876_p12 = pnand %p4875_p11, %p4869_p8 }
 0x2e8   :  { %4321 = vmatpush3.bf16.msra.mxu1 %v4797_v63 }
 0x2e9   :  { %4322 = vmatprep.subr.bf16.mxu1 %v4800_v1 }
 0x2ea   :  { %4343 = vmatpush3.bf16.msra.mxu0 %v4799_v2 }
 0x2eb   :  { %4344 = vmatprep.subr.bf16.mxu0 %v4802_v28 }
 0x2ec   :  { %4323 = vmatpush3.bf16.msra.mxu1 %v4801_v3 }
 0x2ed   :  { %4324 = vmatprep.subr.bf16.mxu1 %v4804_v5 }
 0x2ee   :  { %4345 = vmatpush3.bf16.msra.mxu0 %v4803_v6 }
 0x2ef   :  { %4346 = vmatprep.subr.bf16.mxu0 %v4806_v30 }
 0x2f0   :  { %4325 = vmatpush3.bf16.msra.mxu1 %v4805_v7 }
 0x2f1   :  { %4326 = vmatprep.subr.bf16.mxu1 %v4808_v11 }
 0x2f2   :  { %4347 = vmatpush3.bf16.msra.mxu0 %v4807_v12 }
 0x2f3   :  { %4348 = vmatprep.subr.bf16.mxu0 %v4810_v13 }
 0x2f4   :  { %4327 = vmatpush3.bf16.msra.mxu1 %v4809_v14 }
 0x2f5   :  { %4356 = vmatprep.subr.bf16.mxu1 %v4812_v16 }
 0x2f6   :  { %4349 = vmatpush3.bf16.msra.mxu0 %v4811_v18 }
 0x2f7   :  { %3704 = vmatmul.mubr.bf16.vlgmr.msra.gmra.mrb[24].mxu1 %v2701_v20  ;;  %4378 = vmatprep.subr.bf16.mxu0 %v4815_v21 }
 0x2f8   :  { %4357 = vmatpush3.bf16.msra.mxu1 %v4813_v22  ;;  %3783 = vmatprep.mubr.bf16.mxu1 %v2722_v23 }
 0x2f9   :  { %3744 = vmatmul.mubr.bf16.vlgmr.msra.gmra.mrb[28].mxu0 %v2723_v0  ;;  %4358 = vmatprep.subr.bf16.mxu1 %v4817_v24 }
 0x2fa   :  { %4379 = vmatpush3.bf16.msra.mxu0 %v4816_v25  ;;  %3823 = vmatprep.mubr.bf16.mxu0 %v2726_v27 }
 0x2fb   :  { %4380 = vmatprep.subr.bf16.mxu0 %v4819_v26 }
 0x2fc   :  { %4359 = vmatpush3.bf16.msra.mxu1 %v4818_v31 }
 0x2fd   :  { %4360 = vmatprep.subr.bf16.mxu1 %v4821_v32 }
 0x2fe   :  { %4381 = vmatpush3.bf16.msra.mxu0 %v4820_v33 }
 0x2ff   :  { %4382 = vmatprep.subr.bf16.mxu0 %v4823_v34 }
 0x300   :  { %4361 = vmatpush3.bf16.msra.mxu1 %v4822_v35 }
 0x301   :  { %4362 = vmatprep.subr.bf16.mxu1 %v4825_v17 }
 0x302   :  { %4383 = vmatpush3.bf16.msra.mxu0 %v4824_v36 }
 0x303   :  { %4384 = vmatprep.subr.bf16.mxu0 %v4827_v37 }
 0x304   :  { %4363 = vmatpush3.bf16.msra.mxu1 %v4826_v38 }
 0x305   :  { %4364 = vmatprep.subr.bf16.mxu1 %v4829_v39 }
 0x306   :  { %4385 = vmatpush3.bf16.msra.mxu0 %v4828_v40 }
 0x307   :  { %4386 = vmatprep.subr.bf16.mxu0 %v4831_v41 }
 0x308   :  { %4365 = vmatpush3.bf16.msra.mxu1 %v4830_v42 }
 0x309   :  { %4366 = vmatprep.subr.bf16.mxu1 %v4833_v43 }
 0x30a   :  { %4387 = vmatpush3.bf16.msra.mxu0 %v4832_v44 }
 0x30b   :  { %4388 = vmatprep.subr.bf16.mxu0 %v4835_v45 }
 0x30c   :  { %4367 = vmatpush3.bf16.msra.mxu1 %v4834_v46 }
 0x30d   :  { %4368 = vmatprep.subr.bf16.mxu1 %v4837_v10 }
 0x30e   :  { %4389 = vmatpush3.bf16.msra.mxu0 %v4836_v47 }
 0x30f   :  { %4390 = vmatprep.subr.bf16.mxu0 %v4839_v48 }
 0x310   :  { %4369 = vmatpush3.bf16.msra.mxu1 %v4838_v49 }
 0x311   :  { %4370 = vmatprep.subr.bf16.mxu1 %v4841_v50 }
 0x312   :  { %4391 = vmatpush3.bf16.msra.mxu0 %v4840_v51 }
 0x313   :  { %4392 = vmatprep.subr.bf16.mxu0 %v4843_v52 }
 0x314   :  { %4371 = vmatpush3.bf16.msra.mxu1 %v4842_v53 }
 0x316   :  { %4393 = vmatpush3.bf16.msra.mxu0 %v4844_v54 }
 0x317   :  { %3784 = vmatmul.mubr.bf16.vlgmr.msra.gmra.mrb[28].mxu1 %v2708_v19 }
 0x319   :  { %3824 = vmatmul.mubr.bf16.vlgmr.msra.gmra.mrb[32].mxu0 %v2724_v55 }
 0x38a   :  { %v4240_v56 = vpop.f32.mrb[16].mxu1 }
 0x38b   :  { %v4241_v59 = vpop.f32.mrb[17].mxu1 }
 0x38c   :  { %v4242_v60 = vadd.f32 %v4241_v59, %v4240_v56  ;;  %v4243_v58 = vpop.f32.mrb[18].mxu1  ;;  %v4262_v61 = vpop.f32.mrb[20].mxu0 }
 0x38d   :  { %v4244_v29 = vpop.f32.mrb[19].mxu1  ;;  %v4263_v62 = vpop.f32.mrb[21].mxu0 }
 0x38e   :  { %v3546_v63 = vadd.f32 %v4242_v60, %v4093_v57  ;;  %v4264_v1 = vadd.f32 %v4263_v62, %v4262_v61  ;;  %v4265_v2 = vpop.f32.mrb[22].mxu0 }
 0x38f   :  { %v4266_v9 = vpop.f32.mrb[23].mxu0 }
 0x390   :  { %v3586_v28 = vadd.f32 %v4264_v1, %v3546_v63 }
 0x3aa   :  { %v4284_v3 = vpop.f32.mrb[20].mxu1 }
 0x3ab   :  { %v4285_v4 = vpop.f32.mrb[21].mxu1 }
 0x3ac   :  { %v4286_v5 = vadd.f32 %v4285_v4, %v4284_v3  ;;  %v4287_v6 = vpop.f32.mrb[22].mxu1  ;;  %v4306_v30 = vpop.f32.mrb[24].mxu0 }
 0x3ad   :  { %v4288_v7 = vpop.f32.mrb[23].mxu1  ;;  %v4307_v8 = vpop.f32.mrb[25].mxu0 }
 0x3ae   :  { %v3626_v11 = vadd.f32 %v4286_v5, %v3586_v28  ;;  %v4308_v12 = vadd.f32 %v4307_v8, %v4306_v30  ;;  %v4309_v13 = vpop.f32.mrb[26].mxu0 }
 0x3af   :  { %v4310_v14 = vpop.f32.mrb[27].mxu0 }
 0x3b0   :  { %v3666_v15 = vadd.f32 %v4308_v12, %v3626_v11 }
 0x3ca   :  { %v4328_v16 = vpop.f32.mrb[24].mxu1 }
 0x3cb   :  { %v4329_v18 = vpop.f32.mrb[25].mxu1 }
 0x3cc   :  { %v4330_v20 = vadd.f32 %v4329_v18, %v4328_v16  ;;  %v4331_v21 = vpop.f32.mrb[26].mxu1  ;;  %v4350_v22 = vpop.f32.mrb[28].mxu0 }
 0x3cd   :  { %v4332_v23 = vpop.f32.mrb[27].mxu1  ;;  %v4351_v24 = vpop.f32.mrb[29].mxu0 }
 0x3ce   :  { %v3706_v25 = vadd.f32 %v4330_v20, %v3666_v15  ;;  %v4352_v0 = vadd.f32 %v4351_v24, %v4350_v22  ;;  %v4353_v26 = vpop.f32.mrb[30].mxu0 }
 0x3cf   :  { %v4354_v27 = vpop.f32.mrb[31].mxu0 }
 0x3d0   :  { %v3746_v31 = vadd.f32 %v4352_v0, %v3706_v25 }
 0x3ea   :  { %v4372_v32 = vpop.f32.mrb[28].mxu1 }
 0x3eb   :  { %v4373_v33 = vpop.f32.mrb[29].mxu1 }
 0x3ec   :  { %v4374_v34 = vadd.f32 %v4373_v33, %v4372_v32  ;;  %v4375_v35 = vpop.f32.mrb[30].mxu1  ;;  %v4394_v17 = vpop.f32.mrb[32].mxu0 }
 0x3ed   :  { %v4376_v36 = vpop.f32.mrb[31].mxu1  ;;  %v4395_v37 = vpop.f32.mrb[33].mxu0 }
 0x3ee   :  { %v3786_v38 = vadd.f32 %v4374_v34, %v3746_v31  ;;  %v4396_v39 = vadd.f32 %v4395_v37, %v4394_v17  ;;  %v4397_v40 = vpop.f32.mrb[34].mxu0 }
 0x3ef   :  { %v4398_v41 = vpop.f32.mrb[35].mxu0 }
 0x3f0   :  { %v3826_v42 = vadd.f32 %v4396_v39, %v3786_v38 }
 0x3f2   :  { %3832 = vst.msk [vmem:[#allocation7] sm:$0x3] %vm3831_vm1, %v3826_v42 }
 0x3f3   :  { %4879 = shalt.err (!%p4876_p12)
}
 0x3f4   :  { %s4880_s13 = scalar_lea.hbm %s5640_s7, 32 }
 0x3f5   :  { %p4881_p13 = scmp.ne.s32.totalorder %s5640_s7, %s4880_s13  ;;  %p4884_p0 = scmp.lt.u32.totalorder %s4880_s13, %s5640_s7 }
 0x3f7   :  { %p4886_p1 = pnand %p4884_p0, %p4881_p13 }
 0x3f9   :  { %4889 = shalt.err (!%p4886_p1)
}
 0x3fa   :  { %3842 = dma.vmem_to_hbm [thread:$0]  %s3840_s6, 32, %s5640_s7, [#allocation6]  }
 0x3fb   :  { %4892 = dma.done.wait [#allocation6], 32  }
 0x3fc   :  { %4893 = vsyncadd [#allocation6], 4294967264 }
 0x3fd   :  { %3846 = vsyncpa [#allocation5], 1 }
 0x3fe   :  { %3847 = vsyncpa [#allocation6], 1 }

</bundles_post_ra>
